<compile_context>
chip_gen: v6e
topology: v6e:2x2x1
jax: 0.10.0
libtpu: 0.0.40
codegen_flags: <defaults>
</compile_context>

<pallas_src>
import functools
import math

import jax
import jax.numpy as jnp
from jax.experimental import pallas as pl
from jax.experimental.pallas import tpu as pltpu


# ---------------------------------------------------------------------------
# Device heuristics (perf-review generation-specific knobs)
# ---------------------------------------------------------------------------
def _device_kind():
    try:
        return jax.devices()[0].device_kind.lower()
    except Exception:
        return ""


def _default_bf16_exp():
    # v5e has no bf16 VPU/EUP path -> bf16 exp only adds conversions there.
    return "v5" not in _device_kind()


def _is_v7x():
    k = _device_kind()
    return ("v7" in k) or ("tpu7" in k)


def _default_vmem_limit():
    k = _device_kind()
    if "v5" in k:
        return 64 * 1024 * 1024      # 128 MiB physical, lowest HBM BW -> buffer deep
    return 48 * 1024 * 1024          # v7x has only 64 MiB physical per TC


def _round_up(x, m):
    return ((x + m - 1) // m) * m


def _pick_block(n_pad, cap=512):
    """Largest lane-dense tile (multiple of 128, <= cap) dividing n_pad."""
    for t in (512, 384, 256, 128):
        if t <= cap and t <= n_pad and n_pad % t == 0:
            return t
    return n_pad


# ---------------------------------------------------------------------------
# Kernel 1: K/V 1x1-conv projections (channel-mixing matmuls).
#   Outputs head-split (1, H, hd, TN) bf16 tiles.  The shared-source variant
#   (SuperGlue self-attention: key is value) uses one stacked (2D, D) matmul so
#   the activation tile is loaded once.
# ---------------------------------------------------------------------------
def _kv_proj_kernel(kx_ref, vx_ref, wk_ref, bk_ref, wv_ref, bv_ref,
                    ko_ref, vo_ref):
    _, H, hd, tn = ko_ref.shape
    kp = jnp.dot(wk_ref[...], kx_ref[0], preferred_element_type=jnp.float32) + bk_ref[...]
    vp = jnp.dot(wv_ref[...], vx_ref[0], preferred_element_type=jnp.float32) + bv_ref[...]
    ko_ref[0] = kp.reshape(H, hd, tn).astype(ko_ref.dtype)
    vo_ref[0] = vp.reshape(H, hd, tn).astype(vo_ref.dtype)


def _kv_proj_shared_kernel(x_ref, wkv_ref, bkv_ref, ko_ref, vo_ref):
    _, H, hd, tn = ko_ref.shape
    D = H * hd
    kv = jnp.dot(wkv_ref[...], x_ref[0], preferred_element_type=jnp.float32) + bkv_ref[...]
    ko_ref[0] = kv[:D].reshape(H, hd, tn).astype(ko_ref.dtype)
    vo_ref[0] = kv[D:].reshape(H, hd, tn).astype(vo_ref.dtype)


# ---------------------------------------------------------------------------
# Kernel 2: flash attention over key tiles, with the q projection fused at the
# first key step and the merge 1x1 conv fused at the last key step.
#   grid = (B, num_q_tiles, num_k_tiles); lane-dense transposed layout:
#     s   : (H, TK, TQ)     m, l : (H, 1, TQ)     acc, q : (H, hd, TQ)
# ---------------------------------------------------------------------------
def _flash_mha_kernel(qx_ref, k_ref, v_ref, wq_ref, bq_ref, wm_ref, bm_ref,
                      mask_ref, o_ref, q_sc, m_sc, l_sc, acc_sc,
                      *, apply_mask, exp_dtype):
    ki = pl.program_id(2)

    @pl.when(ki == 0)
    def _init():
        # project q once per (b, qi): wq already head-permuted and pre-scaled
        # by 1/sqrt(head_dim); no qp HBM round trip.
        H, hd, tq = q_sc.shape
        qp = jnp.dot(wq_ref[...], qx_ref[0],
                     preferred_element_type=jnp.float32) + bq_ref[...]
        q_sc[...] = qp.reshape(H, hd, tq).astype(q_sc.dtype)
        m_sc[...] = jnp.full_like(m_sc, -1e30)
        l_sc[...] = jnp.zeros_like(l_sc)
        acc_sc[...] = jnp.zeros_like(acc_sc)

    q = q_sc[...]        # (H, hd, TQ) bf16
    k = k_ref[0]         # (H, hd, TK) bf16
    v = v_ref[0]         # (H, hd, TK) bf16

    # s[h, k, q] = sum_d k[h, d, k] * q[h, d, q]   (f32 accumulation, MXU)
    s = jax.lax.dot_general(k, q, (((1,), (1,)), ((0,), (0,))),
                            preferred_element_type=jnp.float32)   # (H, TK, TQ)

    if apply_mask:
        # precomputed additive 0 / -1e30 mask over key rows (sublane axis)
        s = s + mask_ref[...][None, :, :]        # (TK, 1) -> broadcast

    m_prev = m_sc[...]                                        # (H, 1, TQ)
    m_new = jnp.maximum(m_prev, jnp.max(s, axis=1, keepdims=True))
    alpha = jnp.exp(m_prev - m_new)                           # f32
    p = jnp.exp((s - m_new).astype(exp_dtype))                # bf16 on v6e/v7x
    l_sc[...] = alpha * l_sc[...] + jnp.sum(p.astype(jnp.float32),
                                            axis=1, keepdims=True)
    # pv[h, d, q] = sum_k v[h, d, k] * p[h, k, q]
    pv = jax.lax.dot_general(v, p.astype(v.dtype), (((2,), (1,)), ((0,), (0,))),
                             preferred_element_type=jnp.float32)  # (H, hd, TQ)
    acc_sc[...] = alpha * acc_sc[...] + pv
    m_sc[...] = m_new

    @pl.when(ki == pl.num_programs(2) - 1)
    def _finalize():
        H, hd, tq = acc_sc.shape
        inv_l = pl.reciprocal(l_sc[...], approx=True)   # EUP, off the VALU
        # (H, hd, TQ) is already head-permuted channel order -> (D, TQ) directly
        x = (acc_sc[...] * inv_l).reshape(H * hd, tq).astype(wm_ref.dtype)
        merged = jnp.dot(wm_ref[...], x,
                         preferred_element_type=jnp.float32) + bm_ref[...]
        o_ref[0] = merged.astype(o_ref.dtype)


# ---------------------------------------------------------------------------
# Parameter prep (one-time, outside the hot path)
# ---------------------------------------------------------------------------
def prepare_params(params, num_heads, compute_dtype=jnp.bfloat16):
    """Head-permute, fold 1/sqrt(head_dim) into wq/bq, bf16 cast, stack K/V.
    perm[h*hd + d] = d*H + h groups channels by head; merge columns follow."""
    wq, bq, wk, bk, wv, bv, wm, bm = params
    D = wq.shape[0]
    hd = D // num_heads
    scale = 1.0 / math.sqrt(hd)
    perm = jnp.arange(D).reshape(hd, num_heads).T.reshape(-1)
    f32 = jnp.float32
    wq_p = (wq[perm] * scale).astype(compute_dtype)
    bq_p = (bq[perm] * scale).astype(f32)
    wk_p = wk[perm].astype(compute_dtype)
    bk_p = bk[perm].astype(f32)
    wv_p = wv[perm].astype(compute_dtype)
    bv_p = bv[perm].astype(f32)
    return {
        "wq": wq_p, "bq": bq_p,
        "wk": wk_p, "bk": bk_p, "wv": wv_p, "bv": bv_p,
        "wkv": jnp.concatenate([wk_p, wv_p], axis=0),   # (2D, D) self-attn path
        "bkv": jnp.concatenate([bk_p, bv_p], axis=0),   # (2D, 1)
        "wm": wm[:, perm].astype(compute_dtype), "bm": bm.astype(f32),
    }


# ---------------------------------------------------------------------------
# Wrapper
# ---------------------------------------------------------------------------
def multi_headed_attention(query, key, value, prepared, num_heads, *,
                           block_q=None, block_k=None, shared_kv=None,
                           bf16_exp=None):
    """query/key/value: (B, d_model, N) float32. Returns (B, d_model, N)."""
    B, D, N = query.shape
    assert D % num_heads == 0
    head_dim = D // num_heads
    out_dtype = query.dtype
    compute_dtype = prepared["wq"].dtype
    if shared_kv is None:
        shared_kv = key is value
    if bf16_exp is None:
        bf16_exp = _default_bf16_exp()
    exp_dtype = jnp.bfloat16 if bf16_exp else jnp.float32

    # Lane-dense tiles: pad N to a multiple of 128; pick the largest tile
    # (<=512) dividing the padded length (override via block_q/block_k).
    n_pad = _round_up(N, 128)
    blk_k = block_k or _pick_block(n_pad)
    blk_q = block_q or _pick_block(n_pad)
    assert blk_k % 128 == 0 and n_pad % blk_k == 0
    assert blk_q % 128 == 0 and n_pad % blk_q == 0
    # v7x: two TensorCores shard the parallel grid axes -> keep >= 2 points.
    if block_q is None and _is_v7x() and B * (n_pad // blk_q) < 2:
        for t in (384, 256, 128):
            if t < blk_q and n_pad % t == 0 and B * (n_pad // t) >= 2:
                blk_q = t
                break
    nt_q = n_pad // blk_q
    nt_k = n_pad // blk_k

    if n_pad != N:
        pad = ((0, 0), (0, 0), (0, n_pad - N))
        query = jnp.pad(query, pad)
        key = jnp.pad(key, pad)
        value = jnp.pad(value, pad)
    qc = query.astype(compute_dtype)
    kc = key.astype(compute_dtype)
    vc = value.astype(compute_dtype)

    vmem_cap = dict(vmem_limit_bytes=_default_vmem_limit())

    # Additive key-padding mask: (n_pad, 1) of 0 / -1e30, only added in-kernel
    # when there actually are padded key columns (static).
    cols = jnp.arange(n_pad)
    key_mask = jnp.where(cols < N, jnp.float32(0.0),
                         jnp.float32(-1e30)).reshape(n_pad, 1)
    apply_mask = n_pad != N

    # --- stage 1: K/V projections, head-split layout (B, H, hd, n_pad) ------
    act_spec = pl.BlockSpec((1, D, blk_k), lambda b, n: (b, 0, n))
    head_spec = pl.BlockSpec((1, num_heads, head_dim, blk_k),
                             lambda b, n: (b, 0, 0, n))
    proj_shape = jax.ShapeDtypeStruct((B, num_heads, head_dim, n_pad),
                                      compute_dtype)
    stage1_params = pltpu.CompilerParams(
        dimension_semantics=("parallel", "parallel"), **vmem_cap)

    if shared_kv:
        kp, vp = pl.pallas_call(
            _kv_proj_shared_kernel,
            out_shape=(proj_shape, proj_shape),
            grid=(B, nt_k),
            in_specs=[act_spec,
                      pl.BlockSpec((2 * D, D), lambda b, n: (0, 0)),
                      pl.BlockSpec((2 * D, 1), lambda b, n: (0, 0))],
            out_specs=(head_spec, head_spec),
            compiler_params=stage1_params,
        )(kc, prepared["wkv"], prepared["bkv"])
    else:
        w_spec = pl.BlockSpec((D, D), lambda b, n: (0, 0))
        b_spec = pl.BlockSpec((D, 1), lambda b, n: (0, 0))
        kp, vp = pl.pallas_call(
            _kv_proj_kernel,
            out_shape=(proj_shape, proj_shape),
            grid=(B, nt_k),
            in_specs=[act_spec, act_spec, w_spec, b_spec, w_spec, b_spec],
            out_specs=(head_spec, head_spec),
            compiler_params=stage1_params,
        )(kc, vc, prepared["wk"], prepared["bk"], prepared["wv"], prepared["bv"])

    # --- stage 2: fused q-projection + flash attention + merge conv ---------
    qx_spec = pl.BlockSpec((1, D, blk_q), lambda b, qi, ki: (b, 0, qi))
    kv_spec = pl.BlockSpec((1, num_heads, head_dim, blk_k),
                           lambda b, qi, ki: (b, 0, 0, ki))
    wq_spec = pl.BlockSpec((D, D), lambda b, qi, ki: (0, 0))
    bq_spec = pl.BlockSpec((D, 1), lambda b, qi, ki: (0, 0))
    wm_spec = pl.BlockSpec((D, D), lambda b, qi, ki: (0, 0))
    bm_spec = pl.BlockSpec((D, 1), lambda b, qi, ki: (0, 0))
    mask_spec = pl.BlockSpec((blk_k, 1), lambda b, qi, ki: (ki, 0))

    out = pl.pallas_call(
        functools.partial(_flash_mha_kernel,
                          apply_mask=apply_mask, exp_dtype=exp_dtype),
        out_shape=jax.ShapeDtypeStruct((B, D, n_pad), out_dtype),
        grid=(B, nt_q, nt_k),
        in_specs=[qx_spec, kv_spec, kv_spec, wq_spec, bq_spec,
                  wm_spec, bm_spec, mask_spec],
        out_specs=pl.BlockSpec((1, D, blk_q), lambda b, qi, ki: (b, 0, qi)),
        scratch_shapes=[
            pltpu.VMEM((num_heads, head_dim, blk_q), compute_dtype),  # q tile
            pltpu.VMEM((num_heads, 1, blk_q), jnp.float32),           # running max
            pltpu.VMEM((num_heads, 1, blk_q), jnp.float32),           # running sum
            pltpu.VMEM((num_heads, head_dim, blk_q), jnp.float32),    # accumulator
        ],
        compiler_params=pltpu.CompilerParams(
            dimension_semantics=("parallel", "parallel", "arbitrary"), **vmem_cap),
    )(qc, kp, vp, prepared["wq"], prepared["bq"],
      prepared["wm"], prepared["bm"], key_mask)

    return out[:, :, :N] if n_pad != N else out


# ---------------------------------------------------------------------------
# Pure-JAX reference (f32) and deterministic parameter init
# ---------------------------------------------------------------------------
def reference_forward(query, key, value, params, num_heads):
    B, D, N = query.shape
    hd = D // num_heads
    wq, bq, wk, bk, wv, bv, wm, bm = params

    def conv1x1(w, b, x):  # (D,D), (D,1), (B,D,N)
        return jnp.einsum('oc,bcn->bon', w, x) + b[None, :, :]

    q = conv1x1(wq, bq, query).reshape(B, hd, num_heads, N)
    k = conv1x1(wk, bk, key).reshape(B, hd, num_heads, N)
    v = conv1x1(wv, bv, value).reshape(B, hd, num_heads, N)
    scores = jnp.einsum('bdhn,bdhm->bhnm', q, k) / math.sqrt(hd)
    prob = jax.nn.softmax(scores, axis=-1)
    x = jnp.einsum('bhnm,bdhm->bdhn', prob, v).reshape(B, D, N)
    return conv1x1(wm, bm, x)


def init_params(key, d_model):
    keys = jax.random.split(key, 8)
    bound = 1.0 / math.sqrt(d_model)
    def w(k): return jax.random.uniform(k, (d_model, d_model), jnp.float32, -bound, bound)
    def b(k): return jax.random.uniform(k, (d_model, 1), jnp.float32, -bound, bound)
    # order: wq, bq, wk, bk, wv, bv, w_merge, b_merge
    return (w(keys[0]), b(keys[1]), w(keys[2]), b(keys[3]),
            w(keys[4]), b(keys[5]), w(keys[6]), b(keys[7]))


if __name__ == "__main__":
    B, d_model, num_heads = 2, 32, 4

    root = jax.random.PRNGKey(0)
    k_q, k_k, k_v, k_p, k_x = jax.random.split(root, 5)
    params = init_params(k_p, d_model)
    prepared = prepare_params(params, num_heads)   # one-time, outside hot path

    def rel_err(a, b):
        return float(jnp.max(jnp.abs(a - b)) / (jnp.max(jnp.abs(b)) + 1e-6))

    # --- test 1: cross-attention (distinct q/k/v), single padded tile -------
    N1 = 16
    query = jax.random.normal(k_q, (B, d_model, N1), jnp.float32)
    key_ = jax.random.normal(k_k, (B, d_model, N1), jnp.float32)
    value = jax.random.normal(k_v, (B, d_model, N1), jnp.float32)
    fwd = jax.jit(functools.partial(multi_headed_attention, num_heads=num_heads))
    out = jax.block_until_ready(fwd(query, key_, value, prepared))
    ref = reference_forward(query, key_, value, params, num_heads)
    assert out.shape == (B, d_model, N1) and out.dtype == jnp.float32
    e1 = rel_err(out, ref)
    # bf16 MXU (f32 accumulation) + bf16 exp + approx reciprocal tolerance
    assert e1 < 4e-2, f"cross-attn rel err {e1}"

    # --- test 2: self-attention (shared K/V), multiple key tiles + padding --
    N2 = 200
    x = jax.random.normal(k_x, (B, d_model, N2), jnp.float32)
    fwd_self = jax.jit(functools.partial(
        multi_headed_attention, num_heads=num_heads, shared_kv=True,
        block_q=128, block_k=128))
    out2 = jax.block_until_ready(fwd_self(x, x, x, prepared))
    ref2 = reference_forward(x, x, x, params, num_heads)
    assert out2.shape == (B, d_model, N2) and out2.dtype == jnp.float32
    e2 = rel_err(out2, ref2)
    assert e2 < 4e-2, f"self-attn rel err {e2}"

    print("KERNEL_OK")
</pallas_src>

<mosaic_0001>
module attributes {stable_mosaic.version = 11 : i64} {
  func.func @_kv_proj_kernel(%arg0: i32, %arg1: i32, %arg2: memref<1x32x128xbf16, #tpu.memory_space<vmem>>, %arg3: memref<1x32x128xbf16, #tpu.memory_space<vmem>>, %arg4: memref<32x32xbf16, #tpu.memory_space<vmem>>, %arg5: memref<32x1xf32, #tpu.memory_space<vmem>>, %arg6: memref<32x32xbf16, #tpu.memory_space<vmem>>, %arg7: memref<32x1xf32, #tpu.memory_space<vmem>>, %arg8: memref<1x4x8x128xbf16, #tpu.memory_space<vmem>>, %arg9: memref<1x4x8x128xbf16, #tpu.memory_space<vmem>>) attributes {dimension_semantics = [#tpu.dimension_semantics<parallel>, #tpu.dimension_semantics<parallel>], iteration_bounds = array<i64: 2, 1>, scalar_prefetch = 0 : i64, scratch_operands = 0 : i64, tpu.core_type = #tpu.core_type<tc>, window_params = [{transform_indices = @transform_0, window_bounds = array<i64: 1, 32, 128>}, {transform_indices = @transform_1, window_bounds = array<i64: 1, 32, 128>}, {pipeline_mode = #tpu.pipeline_mode<synchronous>, transform_indices = @transform_2, window_bounds = array<i64: 32, 32>}, {pipeline_mode = #tpu.pipeline_mode<synchronous>, transform_indices = @transform_3, window_bounds = array<i64: 32, 1>}, {pipeline_mode = #tpu.pipeline_mode<synchronous>, transform_indices = @transform_4, window_bounds = array<i64: 32, 32>}, {pipeline_mode = #tpu.pipeline_mode<synchronous>, transform_indices = @transform_5, window_bounds = array<i64: 32, 1>}, {transform_indices = @transform_6, window_bounds = array<i64: 1, 4, 8, 128>}, {transform_indices = @transform_7, window_bounds = array<i64: 1, 4, 8, 128>}]} {
    %c0 = arith.constant 0 : index
    %c0_0 = arith.constant 0 : index
    %0 = vector.load %arg4[%c0, %c0_0] : memref<32x32xbf16, #tpu.memory_space<vmem>>, vector<32x32xbf16>
    %c0_1 = arith.constant 0 : index
    %c0_2 = arith.constant 0 : index
    %c0_3 = arith.constant 0 : index
    %1 = vector.load %arg2[%c0_1, %c0_2, %c0_3] : memref<1x32x128xbf16, #tpu.memory_space<vmem>>, vector<1x32x128xbf16>
    %2 = vector.shape_cast %1 : vector<1x32x128xbf16> to vector<32x128xbf16>
    %cst = arith.constant dense<0.000000e+00> : vector<32x128xf32>
    %3 = tpu.matmul %0, %2, %cst {dimension_numbers = #tpu.dot_dimension_numbers<[1], [0], [0], [1], [0, 0, 1, 1], [], []>} : vector<32x32xbf16>, vector<32x128xbf16>, vector<32x128xf32> -> vector<32x128xf32>
    %c0_4 = arith.constant 0 : index
    %c0_5 = arith.constant 0 : index
    %4 = vector.load %arg5[%c0_4, %c0_5] : memref<32x1xf32, #tpu.memory_space<vmem>>, vector<32x1xf32>
    %5 = vector.broadcast %4 : vector<32x1xf32> to vector<32x128xf32>
    %6 = arith.addf %3, %5 : vector<32x128xf32>
    %c0_6 = arith.constant 0 : index
    %c0_7 = arith.constant 0 : index
    %7 = vector.load %arg6[%c0_6, %c0_7] : memref<32x32xbf16, #tpu.memory_space<vmem>>, vector<32x32xbf16>
    %c0_8 = arith.constant 0 : index
    %c0_9 = arith.constant 0 : index
    %c0_10 = arith.constant 0 : index
    %8 = vector.load %arg3[%c0_8, %c0_9, %c0_10] : memref<1x32x128xbf16, #tpu.memory_space<vmem>>, vector<1x32x128xbf16>
    %9 = vector.shape_cast %8 : vector<1x32x128xbf16> to vector<32x128xbf16>
    %cst_11 = arith.constant dense<0.000000e+00> : vector<32x128xf32>
    %10 = tpu.matmul %7, %9, %cst_11 {dimension_numbers = #tpu.dot_dimension_numbers<[1], [0], [0], [1], [0, 0, 1, 1], [], []>} : vector<32x32xbf16>, vector<32x128xbf16>, vector<32x128xf32> -> vector<32x128xf32>
    %c0_12 = arith.constant 0 : index
    %c0_13 = arith.constant 0 : index
    %11 = vector.load %arg7[%c0_12, %c0_13] : memref<32x1xf32, #tpu.memory_space<vmem>>, vector<32x1xf32>
    %12 = vector.broadcast %11 : vector<32x1xf32> to vector<32x128xf32>
    %13 = arith.addf %10, %12 : vector<32x128xf32>
    %14 = vector.shape_cast %6 : vector<32x128xf32> to vector<4x8x128xf32>
    %15 = arith.truncf %14 : vector<4x8x128xf32> to vector<4x8x128xbf16>
    %c0_14 = arith.constant 0 : index
    %c0_15 = arith.constant 0 : index
    %c0_16 = arith.constant 0 : index
    %c0_17 = arith.constant 0 : index
    %16 = vector.load %arg8[%c0_14, %c0_15, %c0_16, %c0_17] : memref<1x4x8x128xbf16, #tpu.memory_space<vmem>>, vector<1x4x8x128xbf16>
    %17 = vector.shape_cast %16 : vector<1x4x8x128xbf16> to vector<4x8x128xbf16>
    %18 = vector.shape_cast %15 : vector<4x8x128xbf16> to vector<1x4x8x128xbf16>
    tpu.vector_store %arg8[%c0_14, %c0_15, %c0_16, %c0_17], %18 {strides = array<i32>} : memref<1x4x8x128xbf16, #tpu.memory_space<vmem>>, vector<1x4x8x128xbf16>,
    %19 = vector.shape_cast %13 : vector<32x128xf32> to vector<4x8x128xf32>
    %20 = arith.truncf %19 : vector<4x8x128xf32> to vector<4x8x128xbf16>
    %c0_18 = arith.constant 0 : index
    %c0_19 = arith.constant 0 : index
    %c0_20 = arith.constant 0 : index
    %c0_21 = arith.constant 0 : index
    %21 = vector.load %arg9[%c0_18, %c0_19, %c0_20, %c0_21] : memref<1x4x8x128xbf16, #tpu.memory_space<vmem>>, vector<1x4x8x128xbf16>
    %22 = vector.shape_cast %21 : vector<1x4x8x128xbf16> to vector<4x8x128xbf16>
    %23 = vector.shape_cast %20 : vector<4x8x128xbf16> to vector<1x4x8x128xbf16>
    tpu.vector_store %arg9[%c0_18, %c0_19, %c0_20, %c0_21], %23 {strides = array<i32>} : memref<1x4x8x128xbf16, #tpu.memory_space<vmem>>, vector<1x4x8x128xbf16>,
    return
  }
  func.func @transform_0(%arg0: i32, %arg1: i32) -> (i32, i32, i32) {
    %c0_i32 = arith.constant 0 : i32
    %c0_i32_0 = arith.constant 0 : i32
    return %arg0, %c0_i32, %arg1 : i32, i32, i32
  }
  func.func @transform_1(%arg0: i32, %arg1: i32) -> (i32, i32, i32) {
    %c0_i32 = arith.constant 0 : i32
    %c0_i32_0 = arith.constant 0 : i32
    return %arg0, %c0_i32, %arg1 : i32, i32, i32
  }
  func.func @transform_2(%arg0: i32, %arg1: i32) -> (i32, i32) {
    %c0_i32 = arith.constant 0 : i32
    %c0_i32_0 = arith.constant 0 : i32
    %c0_i32_1 = arith.constant 0 : i32
    return %c0_i32, %c0_i32_0 : i32, i32
  }
  func.func @transform_3(%arg0: i32, %arg1: i32) -> (i32, i32) {
    %c0_i32 = arith.constant 0 : i32
    %c0_i32_0 = arith.constant 0 : i32
    %c0_i32_1 = arith.constant 0 : i32
    return %c0_i32, %c0_i32_0 : i32, i32
  }
  func.func @transform_4(%arg0: i32, %arg1: i32) -> (i32, i32) {
    %c0_i32 = arith.constant 0 : i32
    %c0_i32_0 = arith.constant 0 : i32
    %c0_i32_1 = arith.constant 0 : i32
    return %c0_i32, %c0_i32_0 : i32, i32
  }
  func.func @transform_5(%arg0: i32, %arg1: i32) -> (i32, i32) {
    %c0_i32 = arith.constant 0 : i32
    %c0_i32_0 = arith.constant 0 : i32
    %c0_i32_1 = arith.constant 0 : i32
    return %c0_i32, %c0_i32_0 : i32, i32
  }
  func.func @transform_6(%arg0: i32, %arg1: i32) -> (i32, i32, i32, i32) {
    %c0_i32 = arith.constant 0 : i32
    %c0_i32_0 = arith.constant 0 : i32
    %c0_i32_1 = arith.constant 0 : i32
    return %arg0, %c0_i32, %c0_i32_0, %arg1 : i32, i32, i32, i32
  }
  func.func @transform_7(%arg0: i32, %arg1: i32) -> (i32, i32, i32, i32) {
    %c0_i32 = arith.constant 0 : i32
    %c0_i32_0 = arith.constant 0 : i32
    %c0_i32_1 = arith.constant 0 : i32
    return %arg0, %c0_i32, %c0_i32_0, %arg1 : i32, i32, i32, i32
  }
}

module attributes {stable_mosaic.version = 11 : i64} {
  func.func @_flash_mha_kernel(%arg0: i32, %arg1: i32, %arg2: i32, %arg3: memref<1x32x128xbf16, #tpu.memory_space<vmem>>, %arg4: memref<1x4x8x128xbf16, #tpu.memory_space<vmem>>, %arg5: memref<1x4x8x128xbf16, #tpu.memory_space<vmem>>, %arg6: memref<32x32xbf16, #tpu.memory_space<vmem>>, %arg7: memref<32x1xf32, #tpu.memory_space<vmem>>, %arg8: memref<32x32xbf16, #tpu.memory_space<vmem>>, %arg9: memref<32x1xf32, #tpu.memory_space<vmem>>, %arg10: memref<128x1xf32, #tpu.memory_space<vmem>>, %arg11: memref<1x32x128xf32, #tpu.memory_space<vmem>>, %arg12: memref<4x8x128xbf16, #tpu.memory_space<vmem>>, %arg13: memref<4x1x128xf32, #tpu.memory_space<vmem>>, %arg14: memref<4x1x128xf32, #tpu.memory_space<vmem>>, %arg15: memref<4x8x128xf32, #tpu.memory_space<vmem>>) attributes {dimension_semantics = [#tpu.dimension_semantics<parallel>, #tpu.dimension_semantics<parallel>, #tpu.dimension_semantics<arbitrary>], iteration_bounds = array<i64: 2, 1, 1>, scalar_prefetch = 0 : i64, scratch_operands = 4 : i64, tpu.core_type = #tpu.core_type<tc>, window_params = [{transform_indices = @transform_0, window_bounds = array<i64: 1, 32, 128>}, {transform_indices = @transform_1, window_bounds = array<i64: 1, 4, 8, 128>}, {transform_indices = @transform_2, window_bounds = array<i64: 1, 4, 8, 128>}, {pipeline_mode = #tpu.pipeline_mode<synchronous>, transform_indices = @transform_3, window_bounds = array<i64: 32, 32>}, {pipeline_mode = #tpu.pipeline_mode<synchronous>, transform_indices = @transform_4, window_bounds = array<i64: 32, 1>}, {pipeline_mode = #tpu.pipeline_mode<synchronous>, transform_indices = @transform_5, window_bounds = array<i64: 32, 32>}, {pipeline_mode = #tpu.pipeline_mode<synchronous>, transform_indices = @transform_6, window_bounds = array<i64: 32, 1>}, {transform_indices = @transform_7, window_bounds = array<i64: 128, 1>}, {transform_indices = @transform_8, window_bounds = array<i64: 1, 32, 128>}]} {
    %c0_i32 = arith.constant 0 : i32
    %0 = arith.cmpi eq, %arg2, %c0_i32 : i32
    %1 = arith.extui %0 : i1 to i32
    %c0_i32_0 = arith.constant 0 : i32
    %2 = arith.cmpi ne, %1, %c0_i32_0 : i32
    scf.if %2 {
      %c0_36 = arith.constant 0 : index
      %c0_37 = arith.constant 0 : index
      %40 = vector.load %arg6[%c0_36, %c0_37] : memref<32x32xbf16, #tpu.memory_space<vmem>>, vector<32x32xbf16>
      %c0_38 = arith.constant 0 : index
      %c0_39 = arith.constant 0 : index
      %c0_40 = arith.constant 0 : index
      %41 = vector.load %arg3[%c0_38, %c0_39, %c0_40] : memref<1x32x128xbf16, #tpu.memory_space<vmem>>, vector<1x32x128xbf16>
      %42 = vector.shape_cast %41 : vector<1x32x128xbf16> to vector<32x128xbf16>
      %cst_41 = arith.constant dense<0.000000e+00> : vector<32x128xf32>
      %43 = tpu.matmul %40, %42, %cst_41 {dimension_numbers = #tpu.dot_dimension_numbers<[1], [0], [0], [1], [0, 0, 1, 1], [], []>} : vector<32x32xbf16>, vector<32x128xbf16>, vector<32x128xf32> -> vector<32x128xf32>
      %c0_42 = arith.constant 0 : index
      %c0_43 = arith.constant 0 : index
      %44 = vector.load %arg7[%c0_42, %c0_43] : memref<32x1xf32, #tpu.memory_space<vmem>>, vector<32x1xf32>
      %45 = vector.broadcast %44 : vector<32x1xf32> to vector<32x128xf32>
      %46 = arith.addf %43, %45 : vector<32x128xf32>
      %47 = vector.shape_cast %46 : vector<32x128xf32> to vector<4x8x128xf32>
      %48 = arith.truncf %47 : vector<4x8x128xf32> to vector<4x8x128xbf16>
      %c0_44 = arith.constant 0 : index
      %c0_45 = arith.constant 0 : index
      %c0_46 = arith.constant 0 : index
      %49 = vector.load %arg12[%c0_44, %c0_45, %c0_46] : memref<4x8x128xbf16, #tpu.memory_space<vmem>>, vector<4x8x128xbf16>
      tpu.vector_store %arg12[%c0_44, %c0_45, %c0_46], %48 {strides = array<i32>} : memref<4x8x128xbf16, #tpu.memory_space<vmem>>, vector<4x8x128xbf16>,
      %cst_47 = arith.constant -1.000000e+30 : f32
      %50 = vector.broadcast %cst_47 : f32 to vector<4x1x128xf32>
      %c0_48 = arith.constant 0 : index
      %c0_49 = arith.constant 0 : index
      %c0_50 = arith.constant 0 : index
      %51 = vector.load %arg13[%c0_48, %c0_49, %c0_50] : memref<4x1x128xf32, #tpu.memory_space<vmem>>, vector<4x1x128xf32>
      tpu.vector_store %arg13[%c0_48, %c0_49, %c0_50], %50 {strides = array<i32>} : memref<4x1x128xf32, #tpu.memory_space<vmem>>, vector<4x1x128xf32>,
      %cst_51 = arith.constant 0.000000e+00 : f32
      %52 = vector.broadcast %cst_51 : f32 to vector<4x1x128xf32>
      %c0_52 = arith.constant 0 : index
      %c0_53 = arith.constant 0 : index
      %c0_54 = arith.constant 0 : index
      %53 = vector.load %arg14[%c0_52, %c0_53, %c0_54] : memref<4x1x128xf32, #tpu.memory_space<vmem>>, vector<4x1x128xf32>
      tpu.vector_store %arg14[%c0_52, %c0_53, %c0_54], %52 {strides = array<i32>} : memref<4x1x128xf32, #tpu.memory_space<vmem>>, vector<4x1x128xf32>,
      %cst_55 = arith.constant 0.000000e+00 : f32
      %54 = vector.broadcast %cst_55 : f32 to vector<4x8x128xf32>
      %c0_56 = arith.constant 0 : index
      %c0_57 = arith.constant 0 : index
      %c0_58 = arith.constant 0 : index
      %55 = vector.load %arg15[%c0_56, %c0_57, %c0_58] : memref<4x8x128xf32, #tpu.memory_space<vmem>>, vector<4x8x128xf32>
      tpu.vector_store %arg15[%c0_56, %c0_57, %c0_58], %54 {strides = array<i32>} : memref<4x8x128xf32, #tpu.memory_space<vmem>>, vector<4x8x128xf32>,
    } else {
    }
    %c0 = arith.constant 0 : index
    %c0_1 = arith.constant 0 : index
    %c0_2 = arith.constant 0 : index
    %3 = vector.load %arg12[%c0, %c0_1, %c0_2] : memref<4x8x128xbf16, #tpu.memory_space<vmem>>, vector<4x8x128xbf16>
    %c0_3 = arith.constant 0 : index
    %c0_4 = arith.constant 0 : index
    %c0_5 = arith.constant 0 : index
    %c0_6 = arith.constant 0 : index
    %4 = vector.load %arg4[%c0_3, %c0_4, %c0_5, %c0_6] : memref<1x4x8x128xbf16, #tpu.memory_space<vmem>>, vector<1x4x8x128xbf16>
    %5 = vector.shape_cast %4 : vector<1x4x8x128xbf16> to vector<4x8x128xbf16>
    %c0_7 = arith.constant 0 : index
    %c0_8 = arith.constant 0 : index
    %c0_9 = arith.constant 0 : index
    %c0_10 = arith.constant 0 : index
    %6 = vector.load %arg5[%c0_7, %c0_8, %c0_9, %c0_10] : memref<1x4x8x128xbf16, #tpu.memory_space<vmem>>, vector<1x4x8x128xbf16>
    %7 = vector.shape_cast %6 : vector<1x4x8x128xbf16> to vector<4x8x128xbf16>
    %cst = arith.constant dense<0.000000e+00> : vector<4x128x128xf32>
    %8 = tpu.matmul %5, %3, %cst {dimension_numbers = #tpu.dot_dimension_numbers<[1], [1], [2], [2], [0, 0, 0, 2, 1, 2], [0], [0]>} : vector<4x8x128xbf16>, vector<4x8x128xbf16>, vector<4x128x128xf32> -> vector<4x128x128xf32>
    %c0_11 = arith.constant 0 : index
    %c0_12 = arith.constant 0 : index
    %9 = vector.load %arg10[%c0_11, %c0_12] : memref<128x1xf32, #tpu.memory_space<vmem>>, vector<128x1xf32>
    %10 = vector.shape_cast %9 : vector<128x1xf32> to vector<1x128x1xf32>
    %11 = vector.broadcast %10 : vector<1x128x1xf32> to vector<4x128x128xf32>
    %12 = arith.addf %8, %11 : vector<4x128x128xf32>
    %c0_13 = arith.constant 0 : index
    %c0_14 = arith.constant 0 : index
    %c0_15 = arith.constant 0 : index
    %13 = vector.load %arg13[%c0_13, %c0_14, %c0_15] : memref<4x1x128xf32, #tpu.memory_space<vmem>>, vector<4x1x128xf32>
    %cst_16 = arith.constant dense<0xFF800000> : vector<4x128xf32>
    %14 = vector.multi_reduction <maximumf>, %12, %cst_16 [1] : vector<4x128x128xf32> to vector<4x128xf32>
    %15 = vector.shape_cast %14 : vector<4x128xf32> to vector<4x1x128xf32>
    %16 = arith.maximumf %13, %15 : vector<4x1x128xf32>
    %17 = arith.subf %13, %16 : vector<4x1x128xf32>
    %18 = math.exp %17 : vector<4x1x128xf32>
    %19 = vector.broadcast %16 : vector<4x1x128xf32> to vector<4x128x128xf32>
    %20 = arith.subf %12, %19 : vector<4x128x128xf32>
    %21 = arith.truncf %20 : vector<4x128x128xf32> to vector<4x128x128xbf16>
    %22 = math.exp %21 : vector<4x128x128xbf16>
    %c0_17 = arith.constant 0 : index
    %c0_18 = arith.constant 0 : index
    %c0_19 = arith.constant 0 : index
    %23 = vector.load %arg14[%c0_17, %c0_18, %c0_19] : memref<4x1x128xf32, #tpu.memory_space<vmem>>, vector<4x1x128xf32>
    %24 = arith.mulf %18, %23 : vector<4x1x128xf32>
    %25 = arith.extf %22 : vector<4x128x128xbf16> to vector<4x128x128xf32>
    %cst_20 = arith.constant dense<0.000000e+00> : vector<4x128xf32>
    %26 = vector.multi_reduction <add>, %25, %cst_20 [1] : vector<4x128x128xf32> to vector<4x128xf32>
    %27 = vector.shape_cast %26 : vector<4x128xf32> to vector<4x1x128xf32>
    %28 = arith.addf %24, %27 : vector<4x1x128xf32>
    %c0_21 = arith.constant 0 : index
    %c0_22 = arith.constant 0 : index
    %c0_23 = arith.constant 0 : index
    %29 = vector.load %arg14[%c0_21, %c0_22, %c0_23] : memref<4x1x128xf32, #tpu.memory_space<vmem>>, vector<4x1x128xf32>
    tpu.vector_store %arg14[%c0_21, %c0_22, %c0_23], %28 {strides = array<i32>} : memref<4x1x128xf32, #tpu.memory_space<vmem>>, vector<4x1x128xf32>,
    %cst_24 = arith.constant dense<0.000000e+00> : vector<4x8x128xf32>
    %30 = tpu.matmul %7, %22, %cst_24 {dimension_numbers = #tpu.dot_dimension_numbers<[2], [1], [1], [2], [0, 0, 0, 1, 1, 2], [0], [0]>} : vector<4x8x128xbf16>, vector<4x128x128xbf16>, vector<4x8x128xf32> -> vector<4x8x128xf32>
    %c0_25 = arith.constant 0 : index
    %c0_26 = arith.constant 0 : index
    %c0_27 = arith.constant 0 : index
    %31 = vector.load %arg15[%c0_25, %c0_26, %c0_27] : memref<4x8x128xf32, #tpu.memory_space<vmem>>, vector<4x8x128xf32>
    %32 = vector.broadcast %18 : vector<4x1x128xf32> to vector<4x8x128xf32>
    %33 = arith.mulf %32, %31 : vector<4x8x128xf32>
    %34 = arith.addf %33, %30 : vector<4x8x128xf32>
    %c0_28 = arith.constant 0 : index
    %c0_29 = arith.constant 0 : index
    %c0_30 = arith.constant 0 : index
    %35 = vector.load %arg15[%c0_28, %c0_29, %c0_30] : memref<4x8x128xf32, #tpu.memory_space<vmem>>, vector<4x8x128xf32>
    tpu.vector_store %arg15[%c0_28, %c0_29, %c0_30], %34 {strides = array<i32>} : memref<4x8x128xf32, #tpu.memory_space<vmem>>, vector<4x8x128xf32>,
    %c0_31 = arith.constant 0 : index
    %c0_32 = arith.constant 0 : index
    %c0_33 = arith.constant 0 : index
    %36 = vector.load %arg13[%c0_31, %c0_32, %c0_33] : memref<4x1x128xf32, #tpu.memory_space<vmem>>, vector<4x1x128xf32>
    tpu.vector_store %arg13[%c0_31, %c0_32, %c0_33], %16 {strides = array<i32>} : memref<4x1x128xf32, #tpu.memory_space<vmem>>, vector<4x1x128xf32>,
    %c0_i32_34 = arith.constant 0 : i32
    %37 = arith.cmpi eq, %arg2, %c0_i32_34 : i32
    %38 = arith.extui %37 : i1 to i32
    %c0_i32_35 = arith.constant 0 : i32
    %39 = arith.cmpi ne, %38, %c0_i32_35 : i32
    scf.if %39 {
      %c0_36 = arith.constant 0 : index
      %c0_37 = arith.constant 0 : index
      %c0_38 = arith.constant 0 : index
      %40 = vector.load %arg14[%c0_36, %c0_37, %c0_38] : memref<4x1x128xf32, #tpu.memory_space<vmem>>, vector<4x1x128xf32>
      %41 = tpu.reciprocal %40 {approx = true} : vector<4x1x128xf32> -> vector<4x1x128xf32>
      %c0_39 = arith.constant 0 : index
      %c0_40 = arith.constant 0 : index
      %c0_41 = arith.constant 0 : index
      %42 = vector.load %arg15[%c0_39, %c0_40, %c0_41] : memref<4x8x128xf32, #tpu.memory_space<vmem>>, vector<4x8x128xf32>
      %43 = vector.broadcast %41 : vector<4x1x128xf32> to vector<4x8x128xf32>
      %44 = arith.mulf %42, %43 : vector<4x8x128xf32>
      %45 = vector.shape_cast %44 : vector<4x8x128xf32> to vector<32x128xf32>
      %46 = arith.truncf %45 : vector<32x128xf32> to vector<32x128xbf16>
      %c0_42 = arith.constant 0 : index
      %c0_43 = arith.constant 0 : index
      %47 = vector.load %arg8[%c0_42, %c0_43] : memref<32x32xbf16, #tpu.memory_space<vmem>>, vector<32x32xbf16>
      %cst_44 = arith.constant dense<0.000000e+00> : vector<32x128xf32>
      %48 = tpu.matmul %47, %46, %cst_44 {dimension_numbers = #tpu.dot_dimension_numbers<[1], [0], [0], [1], [0, 0, 1, 1], [], []>} : vector<32x32xbf16>, vector<32x128xbf16>, vector<32x128xf32> -> vector<32x128xf32>
      %c0_45 = arith.constant 0 : index
      %c0_46 = arith.constant 0 : index
      %49 = vector.load %arg9[%c0_45, %c0_46] : memref<32x1xf32, #tpu.memory_space<vmem>>, vector<32x1xf32>
      %50 = vector.broadcast %49 : vector<32x1xf32> to vector<32x128xf32>
      %51 = arith.addf %48, %50 : vector<32x128xf32>
      %c0_47 = arith.constant 0 : index
      %c0_48 = arith.constant 0 : index
      %c0_49 = arith.constant 0 : index
      %52 = vector.load %arg11[%c0_47, %c0_48, %c0_49] : memref<1x32x128xf32, #tpu.memory_space<vmem>>, vector<1x32x128xf32>
      %53 = vector.shape_cast %52 : vector<1x32x128xf32> to vector<32x128xf32>
      %54 = vector.shape_cast %51 : vector<32x128xf32> to vector<1x32x128xf32>
      tpu.vector_store %arg11[%c0_47, %c0_48, %c0_49], %54 {strides = array<i32>} : memref<1x32x128xf32, #tpu.memory_space<vmem>>, vector<1x32x128xf32>,
    } else {
    }
    return
  }
  func.func @transform_0(%arg0: i32, %arg1: i32, %arg2: i32) -> (i32, i32, i32) {
    %c0_i32 = arith.constant 0 : i32
    %c0_i32_0 = arith.constant 0 : i32
    return %arg0, %c0_i32, %arg1 : i32, i32, i32
  }
  func.func @transform_1(%arg0: i32, %arg1: i32, %arg2: i32) -> (i32, i32, i32, i32) {
    %c0_i32 = arith.constant 0 : i32
    %c0_i32_0 = arith.constant 0 : i32
    %c0_i32_1 = arith.constant 0 : i32
    return %arg0, %c0_i32, %c0_i32_0, %arg2 : i32, i32, i32, i32
  }
  func.func @transform_2(%arg0: i32, %arg1: i32, %arg2: i32) -> (i32, i32, i32, i32) {
    %c0_i32 = arith.constant 0 : i32
    %c0_i32_0 = arith.constant 0 : i32
    %c0_i32_1 = arith.constant 0 : i32
    return %arg0, %c0_i32, %c0_i32_0, %arg2 : i32, i32, i32, i32
  }
  func.func @transform_3(%arg0: i32, %arg1: i32, %arg2: i32) -> (i32, i32) {
    %c0_i32 = arith.constant 0 : i32
    %c0_i32_0 = arith.constant 0 : i32
    %c0_i32_1 = arith.constant 0 : i32
    return %c0_i32, %c0_i32_0 : i32, i32
  }
  func.func @transform_4(%arg0: i32, %arg1: i32, %arg2: i32) -> (i32, i32) {
    %c0_i32 = arith.constant 0 : i32
    %c0_i32_0 = arith.constant 0 : i32
    %c0_i32_1 = arith.constant 0 : i32
    return %c0_i32, %c0_i32_0 : i32, i32
  }
  func.func @transform_5(%arg0: i32, %arg1: i32, %arg2: i32) -> (i32, i32) {
    %c0_i32 = arith.constant 0 : i32
    %c0_i32_0 = arith.constant 0 : i32
    %c0_i32_1 = arith.constant 0 : i32
    return %c0_i32, %c0_i32_0 : i32, i32
  }
  func.func @transform_6(%arg0: i32, %arg1: i32, %arg2: i32) -> (i32, i32) {
    %c0_i32 = arith.constant 0 : i32
    %c0_i32_0 = arith.constant 0 : i32
    %c0_i32_1 = arith.constant 0 : i32
    return %c0_i32, %c0_i32_0 : i32, i32
  }
  func.func @transform_7(%arg0: i32, %arg1: i32, %arg2: i32) -> (i32, i32) {
    %c0_i32 = arith.constant 0 : i32
    %c0_i32_0 = arith.constant 0 : i32
    return %arg2, %c0_i32 : i32, i32
  }
  func.func @transform_8(%arg0: i32, %arg1: i32, %arg2: i32) -> (i32, i32, i32) {
    %c0_i32 = arith.constant 0 : i32
    %c0_i32_0 = arith.constant 0 : i32
    return %arg0, %c0_i32, %arg1 : i32, i32, i32
  }
}

</mosaic_0001>

<bundles_post_ra>
// kernel: multi_headed_attention.2
= control target key start
LH: loop header
LB: loop body
LE: loop exit
PB: predicated region body
PF: predicated region fallthrough
CT: control target
= control target key end

     0   :  { %s923_s24 = smov 0   ;;  %s925_s25 = smov 0   ;;  %s1008_s0 = inlined_call_operand.vmem [shape: bf16[2,32,128], index: 0, kind: input, shape index: {}]   ;;  %s1009_s1 = inlined_call_operand.vmem [shape: bf16[2,32,128], index: 1, kind: input, shape index: {}]   ;;  %s1010_s2 = inlined_call_operand.vmem [shape: bf16[32,32], index: 2, kind: input, shape index: {}]   ;;  %s1011_s3 = inlined_call_operand.vmem [shape: f32[32,1], index: 3, kind: input, shape index: {}]   ;;  %s1012_s4 = inlined_call_operand.vmem [shape: bf16[32,32], index: 4, kind: input, shape index: {}]   ;;  %s1013_s5 = inlined_call_operand.vmem [shape: f32[32,1], index: 5, kind: input, shape index: {}]   ;;  %s1014_s6 = inlined_call_operand.vmem [shape: bf16[2,4,8,128], index: 6, kind: output, shape index: {0}]   ;;  %s1015_s7 = inlined_call_operand.vmem [shape: bf16[2,4,8,128], index: 7, kind: output, shape index: {1}]  }
   0x1   :  { %s927_s26 = smov 0  }
   0x2 LB: > { %s30_s27 = sadd.s32 1, %s876_s25  ;;  %p750_p0 = scmp.ge.s32.totalorder %s880_s26, 1  ;;  %s880_s26 = sphi %s927_s26, %s18_s26   ;;  %s876_s25 = sphi %s925_s25, %s1017_s25   ;;  %s872_s24 = sphi %s923_s24, %s1016_s24  }
   0x3   : > { %p32_p1 = scmp.ge.s32.totalorder %s30_s27, 2  ;;  %p276_p2 = scmp.lt.s32.totalorder %s880_s26, 3 }
   0x5   : > { %s1019_s27 = smov (%p32_p1, %s30_s27), 0  ;;  %p277_p3 = pnand %p750_p0, %p276_p2 }
   0x6   : > { %p330_p4 = scmp.lt.s32.totalorder (!%p277_p3), %s872_s24, 1 }
   0x7   : > { %280 = sbr.rel (%p277_p3) target bundleno = 229 (0xe5), region = 44 }
   0xc   : > { %v854_v0 = vld [vmem:[%s1010_s2] sm:$0xff]   ;;  %vm417_vm0 = vcmask 261120   ;;  %s1021_s24 = smov (!%p330_p4, %s872_s24), 1  ;;  %v882_v2 = vmov 0   ;;  %v373_v3 = vld [vmem:[%s1011_s3 + $0x10] sm:$0xff]  ;;  %v374_v6 = vld [vmem:[%s1011_s3 + $0x18] sm:$0xff] }
   0xd   : > { %v855_v1 = vld [vmem:[%s1012_s4] sm:$0xff]   ;;  %811 = vmatprep.mubr.msk.bf16.mxu0 %vm417_vm0, %v854_v0  ;;  %s949_s9 = sshll.u32 %s1021_s24, 4  ;;  %849 = vset.pattern.permute.xlu1 %v882_v2  ;;  %v372_v8 = vld [vmem:[%s1011_s3 + $0x8] sm:$0xff]  ;;  %v484_v15 = vld [vmem:[%s1013_s5 + $0x18] sm:$0xff] }
   0xe   : > { %819 = vmatprep.mubr.msk.bf16.mxu1 %vm417_vm0, %v855_v1  ;;  %848 = vset.pattern.permute.xlu0 %v882_v2  ;;  %v371_v4 = vld [vmem:[%s1011_s3] sm:$0xff]  ;;  %s337_s16 = scalar_lea.vmem %s1008_s0, %s949_s9  ;;  %s345_s19 = scalar_lea.vmem %s1009_s1, %s949_s9  ;;  %v856_v11 = vld [vmem:[%s1010_s2 + $0x8] sm:$0xff]   ;;  %v483_v16 = vld [vmem:[%s1013_s5 + $0x10] sm:$0xff] }
   0xf   : > { %387 = vperm.xlu1 %849, %v373_v3   ;;  %377 = vperm.xlu0 %848, %v371_v4   ;;  %v850_v5 = vld [vmem:[%s337_s16 + $0x8] sm:$0xff]   ;;  %v852_v9 = vld [vmem:[%s337_s16] sm:$0xff]   ;;  %s361_s22 = scalar_lea.vmem %s1015_s7, %s949_s9 }
  0x10   : > { %v851_v7 = vld [vmem:[%s345_s19 + $0x8] sm:$0xff]   ;;  %807 = vmatprep.subr.bf16.mxu0 %v850_v5  ;;  %v853_v10 = vld [vmem:[%s345_s19] sm:$0xff]   ;;  %s353_s19 = scalar_lea.vmem %s1014_s6, %s949_s9 }
  0x11   : > { %815 = vmatprep.subr.bf16.mxu1 %v851_v7  ;;  %808 = vmatpush3.bf16.msra.mxu0 %v850_v5  ;;  %v482_v12 = vld [vmem:[%s1013_s5 + $0x8] sm:$0xff]  ;;  %v481_v14 = vld [vmem:[%s1013_s5] sm:$0xff] }
  0x12   : > { %816 = vmatpush3.bf16.msra.mxu1 %v851_v7  ;;  %809 = vmatprep.subr.bf16.mxu0 %v852_v9  ;;  %v857_v13 = vld [vmem:[%s1012_s4 + $0x8] sm:$0xff]  }
  0x13   : > { %817 = vmatprep.subr.bf16.mxu1 %v853_v10  ;;  %392 = vperm.xlu1 %849, %v374_v6  }
  0x14   : > { %382 = vperm.xlu0 %848, %v372_v8  }
  0x15   : > { %810 = vmatpush3.bf16.msra.mxu0 %v852_v9 }
  0x16   : > { %818 = vmatpush3.bf16.msra.mxu1 %v853_v10 }
  0x17   : > { %492 = vperm.xlu1 %849, %v482_v12  }
  0x18   : > { %812 = vmatmul.mubr.msk.bf16.vlgmr.msra.gmra.mxu0 %vm417_vm0, %v856_v11  ;;  %487 = vperm.xlu0 %848, %v481_v14  }
  0x19   : > { %820 = vmatmul.mubr.msk.bf16.vlgmr.msra.gmra.mxu1 %vm417_vm0, %v857_v13 }
  0x1b   : > { %502 = vperm.xlu1 %849, %v484_v15  }
  0x1c   : > { %497 = vperm.xlu0 %848, %v483_v16  }
  0x8a   : > { %v388_v17 = vpop.permute.xlu1 %387  ;;  %v378_v18 = vpop.permute.xlu0 %377 }
  0x8e   : > { %v393_v19 = vpop.permute.xlu1 %392 }
  0x8f   : > { %v383_v20 = vpop.permute.xlu0 %382 }
  0x92   : > { %v493_v21 = vpop.permute.xlu1 %492 }
  0x93   : > { %v488_v22 = vpop.permute.xlu0 %487 }
  0x96   : > { %v503_v27 = vpop.permute.xlu1 %502 }
  0x97   : > { %v498_v29 = vpop.permute.xlu0 %497 }
  0xd8   : > { %v813_v23 = vpop.f32.mrf.mxu0 }
  0xd9   : > { %v821_v24 = vpop.f32.mrf.mxu1  ;;  %v467_v30 = vadd.f32 %v813_v23, %v388_v17 }
  0xda   : > { %v458_v25 = vpop.f32.mrf.mxu0  ;;  %v576_v33 = vadd.f32 %v821_v24, %v498_v29 }
  0xdb   : > { %v567_v26 = vpop.f32.mrf.mxu1  ;;  %v459_v36 = vadd.f32 %v458_v25, %v378_v18 }
  0xdc   : > { %v814_v28 = vpop.f32.mrf.mxu0  ;;  %v568_v40 = vadd.f32 %v567_v26, %v488_v22 }
  0xdd   : > { %v470_v31 = vadd.f32 %v814_v28, %v393_v19  ;;  %v822_v32 = vpop.f32.mrf.mxu1 }
  0xde   : > { %v579_v34 = vadd.f32 %v822_v32, %v503_v27  ;;  %v461_v35 = vpop.f32.mrf.mxu0 }
  0xdf   : > { %v785_v37 = vpack.c.bf16 %v470_v31, %v467_v30  ;;  %v462_v38 = vadd.f32 %v461_v35, %v383_v20  ;;  %v570_v39 = vpop.f32.mrf.mxu1 }
  0xe0   : > { %v795_v41 = vpack.c.bf16 %v579_v34, %v576_v33  ;;  %v571_v42 = vadd.f32 %v570_v39, %v493_v21 }
  0xe1   : > { %797 = vst [vmem:[%s353_s19 + $0x8] sm:$0xff] %v785_v37   ;;  %v780_v43 = vpack.c.bf16 %v462_v38, %v459_v36 }
  0xe2   : > { %798 = vst [vmem:[%s361_s22 + $0x8] sm:$0xff] %v795_v41   ;;  %v790_v44 = vpack.c.bf16 %v571_v42, %v568_v40 }
  0xe3   : > { %781 = vst [vmem:[%s353_s19] sm:$0xff] %v780_v43  }
  0xe4   : > { %791 = vst [vmem:[%s361_s22] sm:$0xff] %v790_v44  }
  0xe5 PF: > { %s18_s26 = sadd.s32 1, %s880_s26   ;;  %s1016_s24 = smov %s876_s25 }
  0xe6   : > { %p15_p5 = scmp.ge.s32.totalorder %s18_s26, 4   ;;  %s1017_s25 = smov %s1019_s27 }
  0xe8   :  { %17 = sbr.rel (!%p15_p5) target bundleno = 2 (0x2), region = 89 }

// kernel: multi_headed_attention.3
= control target key start
LH: loop header
LB: loop body
LE: loop exit
PB: predicated region body
PF: predicated region fallthrough
CT: control target
= control target key end

     0   :  { %s2716_s27 = smov 0   ;;  %s2718_s28 = smov 0   ;;  %s3605_s0 = inlined_call_operand.vmem [shape: bf16[2,32,128], index: 0, kind: input, shape index: {}]   ;;  %s3606_s1 = inlined_call_operand.vmem [shape: bf16[2,4,8,128], index: 1, kind: input, shape index: {}]   ;;  %s3607_s2 = inlined_call_operand.vmem [shape: bf16[2,4,8,128], index: 2, kind: input, shape index: {}]   ;;  %s3608_s3 = inlined_call_operand.vmem [shape: bf16[32,32], index: 3, kind: input, shape index: {}]   ;;  %s3609_s4 = inlined_call_operand.vmem [shape: f32[32,1], index: 4, kind: input, shape index: {}]   ;;  %s3610_s5 = inlined_call_operand.vmem [shape: bf16[32,32], index: 5, kind: input, shape index: {}]   ;;  %s3611_s6 = inlined_call_operand.vmem [shape: f32[32,1], index: 6, kind: input, shape index: {}]   ;;  %s3612_s7 = inlined_call_operand.vmem [shape: f32[128,1], index: 7, kind: input, shape index: {}]   ;;  %s3613_s8 = inlined_call_operand.vmem [shape: f32[2,32,128], index: 8, kind: output, shape index: {}]  }
   0x1   :  { %s2720_s29 = smov 0  }
   0x2 LB: > { %s37_s30 = sadd.s32 1, %s2661_s28  ;;  %p2207_p0 = scmp.ge.s32.totalorder %s2665_s29, 1  ;;  %s2665_s29 = sphi %s2720_s29, %s18_s29   ;;  %s2661_s28 = sphi %s2718_s28, %s3694_s28   ;;  %s2657_s27 = sphi %s2716_s27, %s3693_s27  }
   0x3   : > { %p39_p1 = scmp.ge.s32.totalorder %s37_s30, 2  ;;  %p329_p2 = scmp.lt.s32.totalorder %s2665_s29, 3 }
   0x5   : > { %s3696_s30 = smov (%p39_p1, %s37_s30), 0  ;;  %p330_p3 = pnand %p2207_p0, %p329_p2 }
   0x7   : > { %333 = sbr.rel (%p330_p3) target bundleno = 1016 (0x3f8), region = 52 }
   0xc   : > { %v443_v0 = vld [vmem:[%s3609_s4 + $0x10] sm:$0xff]  ;;  %v441_v1 = vld [vmem:[%s3609_s4] sm:$0xff]  ;;  %p390_p4 = scmp.lt.s32.totalorder %s2657_s27, 1  ;;  %v2667_v2 = vmov 0   ;;  %vm487_vm0 = vcmask 261120   ;;  %v444_v4 = vld [vmem:[%s3609_s4 + $0x18] sm:$0xff] }
   0xd   : > { %2556 = vset.pattern.permute.xlu1 %v2667_v2  ;;  %2555 = vset.pattern.permute.xlu0 %v2667_v2  ;;  %v2559_v3 = vld [vmem:[%s3608_s3] sm:$0xff]   ;;  %v442_v5 = vld [vmem:[%s3609_s4 + $0x8] sm:$0xff]  ;;  %v578_v15 = vld [vmem:[%s3612_s7 + $0x18] sm:$0xff]  ;;  %vm687_vm1 = vcmask 64512   ;;  %vm712_vm2 = vcmask 1043456   ;;  %vm2670_vm3 = vmmov 0  }
   0xe   : > { %457 = vperm.xlu1 %2556, %v443_v0   ;;  %447 = vperm.xlu0 %2555, %v441_v1   ;;  %s3698_s27 = smov (!%p390_p4, %s2657_s27), 1  ;;  %v2560_v8 = vld [vmem:[%s3608_s3 + $0x8] sm:$0xff]   ;;  %v575_v14 = vld [vmem:[%s3612_s7] sm:$0xff]  ;;  %v577_v16 = vld [vmem:[%s3612_s7 + $0x10] sm:$0xff] }
   0xf   : > { %s2752_s19 = sshll.u32 %s3698_s27, 4  ;;  %2359 = vmatprep.mubr.msk.bf16.mxu0 %vm487_vm0, %v2559_v3  ;;  %v576_v13 = vld [vmem:[%s3612_s7 + $0x8] sm:$0xff]  ;;  %v579_v18 = vld [vmem:[%s3612_s7 + $0x20] sm:$0xff]  ;;  %v582_v19 = vld [vmem:[%s3612_s7 + $0x38] sm:$0xff]  ;;  %s2263_s23 = sshll.u32 %s3698_s27, 5 }
  0x10   : > { %s397_s22 = scalar_lea.vmem %s3605_s0, %s2752_s19  ;;  %s405_s9 = scalar_lea.vmem %s3606_s1, %s2752_s19  ;;  %v580_v17 = vld [vmem:[%s3612_s7 + $0x28] sm:$0xff]  ;;  %v581_v20 = vld [vmem:[%s3612_s7 + $0x30] sm:$0xff]  ;;  %v583_v22 = vld [vmem:[%s3612_s7 + $0x40] sm:$0xff] }
  0x11   : > { %v2557_v6 = vld [vmem:[%s397_s22 + $0x8] sm:$0xff]   ;;  %v2558_v7 = vld [vmem:[%s397_s22] sm:$0xff]   ;;  %v586_v23 = vld [vmem:[%s3612_s7 + $0x58] sm:$0xff]  ;;  %s3469_s18 = scalar_lea.vmem %s3607_s2, %s2752_s19  ;;  %s427_s26 = scalar_lea.vmem %s3613_s8, %s2263_s23 }
  0x12   : > { %462 = vperm.xlu1 %2556, %v444_v4   ;;  %452 = vperm.xlu0 %2555, %v442_v5   ;;  %v567_v9 = vld [vmem:[%s405_s9] sm:$0xf]  ;;  %v568_v10 = vld [vmem:[%s405_s9 + $0x4] sm:$0xf]  ;;  %v569_v11 = vld [vmem:[%s405_s9 + $0x8] sm:$0xf] }
  0x13   : > { %2355 = vmatprep.subr.bf16.mxu0 %v2557_v6  ;;  %v570_v12 = vld [vmem:[%s405_s9 + $0xc] sm:$0xf]  ;;  %v585_v24 = vld [vmem:[%s3612_s7 + $0x50] sm:$0xff]  ;;  %v587_v26 = vld [vmem:[%s3612_s7 + $0x60] sm:$0xff] }
  0x14   : > { %2356 = vmatpush3.bf16.msra.mxu0 %v2557_v6  ;;  %v584_v21 = vld [vmem:[%s3612_s7 + $0x48] sm:$0xff]  ;;  %v590_v28 = vld [vmem:[%s3612_s7 + $0x78] sm:$0xff]  ;;  %v589_v29 = vld [vmem:[%s3612_s7 + $0x70] sm:$0xff] }
  0x15   : > { %2357 = vmatprep.subr.bf16.mxu0 %v2558_v7  ;;  %v588_v25 = vld [vmem:[%s3612_s7 + $0x68] sm:$0xff]  ;;  %v1970_v33 = vld [vmem:[%s3611_s6] sm:$0xff]  ;;  %v1973_v36 = vld [vmem:[%s3611_s6 + $0x18] sm:$0xff] }
  0x16   : > { %v1971_v32 = vld [vmem:[%s3611_s6 + $0x8] sm:$0xff]  ;;  %v1972_v37 = vld [vmem:[%s3611_s6 + $0x10] sm:$0xff] }
  0x18   : > { %2358 = vmatpush3.bf16.msra.mxu0 %v2558_v7 }
  0x1b   : > { %2360 = vmatmul.mubr.msk.bf16.vlgmr.msra.gmra.mxu0 %vm487_vm0, %v2560_v8 }
  0x30   : > { %671 = vxpose.xlu0.c.b16.start.end [1/1] (short) %v567_v9, 128 }
  0x35   : > { %813 = vxpose.xlu1.c.b16.start.end [1/1] (short) %v568_v10, 128 }
  0x4d   : > { %953 = vxpose.xlu0.c.b16.start.end [1/1] (short) %v569_v11, 128 }
  0x52   : > { %1093 = vxpose.xlu1.c.b16.start.end [1/1] (short) %v570_v12, 128 }
  0x72   : > { %598 = vperm.xlu1 %2556, %v576_v13   ;;  %593 = vperm.xlu0 %2555, %v575_v14  }
  0x76   : > { %608 = vperm.xlu1 %2556, %v578_v15   ;;  %603 = vperm.xlu0 %2555, %v577_v16  }
  0x7a   : > { %618 = vperm.xlu1 %2556, %v580_v17   ;;  %613 = vperm.xlu0 %2555, %v579_v18  }
  0x7e   : > { %628 = vperm.xlu1 %2556, %v582_v19   ;;  %623 = vperm.xlu0 %2555, %v581_v20  }
  0x82   : > { %638 = vperm.xlu1 %2556, %v584_v21   ;;  %633 = vperm.xlu0 %2555, %v583_v22  }
  0x86   : > { %648 = vperm.xlu1 %2556, %v586_v23   ;;  %643 = vperm.xlu0 %2555, %v585_v24   ;;  %v2668_v23 = vmov -1e+30   ;;  %v3614_v24 = vmov 0.0  }
  0x87   : > { %551 = vst [vmem:[#allocation3] sm:$0x1] %v2668_v23  ;;  %552 = vst [vmem:[#allocation3 + $0x1] sm:$0x1] %v2668_v23 }
  0x88   : > { %553 = vst [vmem:[#allocation3 + $0x2] sm:$0x1] %v2668_v23  ;;  %554 = vst [vmem:[#allocation3 + $0x3] sm:$0x1] %v2668_v23 }
  0x89   : > { %v448_v27 = vpop.permute.xlu0 %447  ;;  %v458_v30 = vpop.permute.xlu1 %457  ;;  %555 = vst [vmem:[#allocation4] sm:$0x1] %v3614_v24  ;;  %556 = vst [vmem:[#allocation4 + $0x1] sm:$0x1] %v3614_v24 }
  0x8a   : > { %658 = vperm.xlu1 %2556, %v588_v25   ;;  %653 = vperm.xlu0 %2555, %v587_v26   ;;  %557 = vst [vmem:[#allocation4 + $0x2] sm:$0x1] %v3614_v24  ;;  %558 = vst [vmem:[#allocation4 + $0x3] sm:$0x1] %v3614_v24 }
  0x8d   : > { %v453_v31 = vpop.permute.xlu0 %452  ;;  %v463_v34 = vpop.permute.xlu1 %462 }
  0x8e   : > { %668 = vperm.xlu1 %2556, %v590_v28   ;;  %663 = vperm.xlu0 %2555, %v589_v29  }
  0x92   : > { %1981 = vperm.xlu1 %2556, %v1971_v32   ;;  %1976 = vperm.xlu0 %2555, %v1970_v33   ;;  %v679_v35 = vpop.trf.xlu0 }
  0x93   : > { %2365 = vmatprep.mubr.msk.bf16.mxu1 %vm687_vm1, %v679_v35 }
  0x96   : > { %1991 = vperm.xlu1 %2556, %v1973_v36   ;;  %1986 = vperm.xlu0 %2555, %v1972_v37   ;;  %v680_v40 = vpop.trf.xlu0 }
  0x97   : > { %v821_v38 = vpop.trf.xlu1 }
  0x98   : > { %2383 = vmatprep.mubr.msk.bf16.mxu0 %vm687_vm1, %v821_v38 }
  0x9a   : > { %v681_v42 = vpop.trf.xlu0 }
  0x9b   : > { %v822_v39 = vpop.trf.xlu1 }
  0x9e   : > { %v682_v47 = vpop.trf.xlu0 }
  0x9f   : > { %v823_v41 = vpop.trf.xlu1 }
  0xa2   : > { %v683_v56 = vpop.trf.xlu0 }
  0xa3   : > { %v824_v46 = vpop.trf.xlu1 }
  0xa6   : > { %v684_v58 = vpop.trf.xlu0 }
  0xa7   : > { %v825_v55 = vpop.trf.xlu1 }
  0xaa   : > { %v685_v2 = vpop.trf.xlu0 }
  0xab   : > { %v826_v57 = vpop.trf.xlu1 }
  0xae   : > { %v686_v6 = vpop.trf.xlu0 }
  0xaf   : > { %v827_v1 = vpop.trf.xlu1 }
  0xb2   : > { %v961_v8 = vpop.trf.xlu0 }
  0xb3   : > { %v828_v5 = vpop.trf.xlu1 }
  0xb6   : > { %v962_v10 = vpop.trf.xlu0 }
  0xb7   : > { %v1101_v7 = vpop.trf.xlu1 }
  0xba   : > { %v963_v12 = vpop.trf.xlu0 }
  0xbb   : > { %v1102_v9 = vpop.trf.xlu1 }
  0xbe   : > { %v964_v14 = vpop.trf.xlu0 }
  0xbf   : > { %v1103_v11 = vpop.trf.xlu1 }
  0xc2   : > { %v965_v16 = vpop.trf.xlu0 }
  0xc3   : > { %v1104_v13 = vpop.trf.xlu1 }
  0xc6   : > { %v966_v18 = vpop.trf.xlu0 }
  0xc7   : > { %v1105_v15 = vpop.trf.xlu1 }
  0xca   : > { %v967_v20 = vpop.trf.xlu0 }
  0xcb   : > { %v1106_v17 = vpop.trf.xlu1 }
  0xce   : > { %v968_v22 = vpop.trf.xlu0 }
  0xcf   : > { %v1107_v19 = vpop.trf.xlu1 }
  0xd3   : > { %v1108_v21 = vpop.trf.xlu1 }
  0xdb   : > { %v2361_v43 = vpop.f32.mrf.mxu0 }
  0xdc   : > { %v537_v48 = vadd.f32 %v2361_v43, %v458_v30 }
  0xdd   : > { %v528_v44 = vpop.f32.mrf.mxu0 }
  0xde   : > { %v529_v51 = vadd.f32 %v528_v44, %v448_v27 }
  0xdf   : > { %v2362_v45 = vpop.f32.mrf.mxu0 }
  0xe0   : > { %v540_v49 = vadd.f32 %v2362_v45, %v463_v34 }
  0xe1   : > { %v531_v50 = vpop.f32.mrf.mxu0 }
  0xe2   : > { %v2272_v52 = vpack.c.bf16 %v540_v49, %v537_v48  ;;  %v532_v53 = vadd.f32 %v531_v50, %v453_v31 }
  0xe4   : > { %2274 = vst [vmem:[#allocation2 + $0x8] sm:$0xff] %v2272_v52   ;;  %v2267_v54 = vpack.c.bf16 %v532_v53, %v529_v51 }
  0xe6   : > { %2268 = vst [vmem:[#allocation2] sm:$0xff] %v2267_v54  }
  0xeb   : > { %v565_v63 = vld [vmem:[#allocation2 + $0x8] sm:$0xf]  ;;  %v566_v0 = vld [vmem:[#allocation2 + $0xc] sm:$0xf] }
  0xec   : > { %v994_v3 = vsel %vm712_vm2, %v565_v63, 0  ;;  %v1134_v4 = vsel %vm712_vm2, %v566_v0, 0 }
  0xed   : > { %v563_v59 = vld [vmem:[#allocation2] sm:$0xf]  ;;  %v564_v60 = vld [vmem:[#allocation2 + $0x4] sm:$0xf]  ;;  %v2873_v25 = vpop.permute.xlu0 %593  ;;  %v2875_v26 = vpop.permute.xlu1 %598 }
  0xee   : > { %2523 = vmatprep.subr.msk.bf16.mxu1 %vm712_vm2, %v563_v59  ;;  %2524 = vmatprep.subr.msk.bf16.mxu0 %vm712_vm2, %v564_v60  ;;  %v714_v61 = vsel %vm712_vm2, %v563_v59, 0  ;;  %v854_v62 = vsel %vm712_vm2, %v564_v60, 0 }
  0xef   : > { %2364 = vmatpush3.bf16.msra.mxu1 %v714_v61  ;;  %2382 = vmatpush3.bf16.msra.mxu0 %v854_v62 }
  0xf0   : > { %2525 = vmatprep.subr.msk.bf16.mxu1 %vm712_vm2, %v565_v63  ;;  %2526 = vmatprep.subr.msk.bf16.mxu0 %vm712_vm2, %v566_v0 }
  0xf1   : > { %v2877_v27 = vpop.permute.xlu0 %603  ;;  %v2879_v28 = vpop.permute.xlu1 %608 }
  0xf2   : > { %2366 = vmatmul.mubr.msk.bf16.vlgmr.msra.gmra.mxu1 %vm687_vm1, %v680_v40  ;;  %2384 = vmatmul.mubr.msk.bf16.vlgmr.msra.gmra.mxu0 %vm687_vm1, %v822_v39 }
  0xf3   : > { %2400 = vmatpush3.bf16.msra.mxu1 %v994_v3  ;;  %2418 = vmatpush3.bf16.msra.mxu0 %v1134_v4 }
  0xf4   : > { %2369 = vmatprep.mubr.msk.bf16.mxu1 %vm687_vm1, %v681_v42  ;;  %2387 = vmatprep.mubr.msk.bf16.mxu0 %vm687_vm1, %v823_v41 }
  0xf5   : > { %2435 = vmatprep.subr.bf16.mxu1 %v3614_v24  ;;  %2455 = vmatprep.subr.bf16.mxu0 %v3614_v24  ;;  %v2881_v31 = vpop.permute.xlu0 %613  ;;  %v2883_v34 = vpop.permute.xlu1 %618 }
  0xf9   : > { %v2885_v39 = vpop.permute.xlu0 %623 }
  0xfa   : > { %2370 = vmatmul.mubr.msk.bf16.gmra.mxu1 %vm687_vm1, %v682_v47  ;;  %2388 = vmatmul.mubr.msk.bf16.gmra.mxu0 %vm687_vm1, %v824_v46  ;;  %v2899_v46 = vpop.permute.xlu1 %628 }
  0xfb   : > { %2373 = vmatprep.mubr.msk.bf16.mxu1 %vm687_vm1, %v683_v56  ;;  %2391 = vmatprep.mubr.msk.bf16.mxu0 %vm687_vm1, %v825_v55 }
  0xfd   : > { %v2919_v59 = vpop.permute.xlu0 %633 }
 0x102   : > { %2374 = vmatmul.mubr.msk.bf16.gmra.mxu1 %vm687_vm1, %v684_v58  ;;  %2392 = vmatmul.mubr.msk.bf16.gmra.mxu0 %vm687_vm1, %v826_v57 }
 0x103   : > { %2377 = vmatprep.mubr.msk.bf16.mxu1 %vm687_vm1, %v685_v2  ;;  %2395 = vmatprep.mubr.msk.bf16.mxu0 %vm687_vm1, %v827_v1  ;;  %v2933_v2 = vpop.permute.xlu1 %638 }
 0x10a   : > { %2378 = vmatmul.mubr.msk.bf16.gmra.mxu1 %vm687_vm1, %v686_v6  ;;  %2396 = vmatmul.mubr.msk.bf16.gmra.mxu0 %vm687_vm1, %v828_v5 }
 0x10b   : > { %2401 = vmatprep.mubr.msk.bf16.mxu1 %vm687_vm1, %v961_v8  ;;  %2419 = vmatprep.mubr.msk.bf16.mxu0 %vm687_vm1, %v1101_v7 }
 0x112   : > { %2402 = vmatmul.mubr.msk.bf16.vlgmr.msra.gmra.mxu1 %vm687_vm1, %v962_v10  ;;  %2420 = vmatmul.mubr.msk.bf16.vlgmr.msra.gmra.mxu0 %vm687_vm1, %v1102_v9 }
 0x113   : > { %2405 = vmatprep.mubr.msk.bf16.mxu1 %vm687_vm1, %v963_v12  ;;  %2423 = vmatprep.mubr.msk.bf16.mxu0 %vm687_vm1, %v1103_v11 }
 0x11a   : > { %2406 = vmatmul.mubr.msk.bf16.gmra.mxu1 %vm687_vm1, %v964_v14  ;;  %2424 = vmatmul.mubr.msk.bf16.gmra.mxu0 %vm687_vm1, %v1104_v13 }
 0x11b   : > { %2409 = vmatprep.mubr.msk.bf16.mxu1 %vm687_vm1, %v965_v16  ;;  %2427 = vmatprep.mubr.msk.bf16.mxu0 %vm687_vm1, %v1105_v15  ;;  %v2951_v15 = vpop.permute.xlu0 %643 }
 0x122   : > { %2410 = vmatmul.mubr.msk.bf16.gmra.mxu1 %vm687_vm1, %v966_v18  ;;  %2428 = vmatmul.mubr.msk.bf16.gmra.mxu0 %vm687_vm1, %v1106_v17 }
 0x123   : > { %2413 = vmatprep.mubr.msk.bf16.mxu1 %vm687_vm1, %v967_v20  ;;  %2431 = vmatprep.mubr.msk.bf16.mxu0 %vm687_vm1, %v1107_v19 }
 0x12a   : > { %2414 = vmatmul.mubr.msk.bf16.gmra.mxu1 %vm687_vm1, %v968_v22  ;;  %2432 = vmatmul.mubr.msk.bf16.gmra.mxu0 %vm687_vm1, %v1108_v21  ;;  %v2961_v22 = vpop.permute.xlu1 %648 }
 0x12b   : > { %2451 = vmatprep.mubr.msk.bf16.mxu1 %vm2670_vm3, %v3614_v24  ;;  %2471 = vmatprep.mubr.msk.bf16.mxu0 %vm2670_vm3, %v3614_v24 }
 0x1b2   : > { %v2367_v29 = vpop.f32.mrf.mxu1  ;;  %v2385_v30 = vpop.f32.mrf.mxu0 }
 0x1b3   : > { %v2902_v47 = vadd.f32 %v2367_v29, %v2877_v27  ;;  %v2905_v48 = vadd.f32 %v2385_v30, %v2877_v27 }
 0x1b4   : > { %v750_v32 = vpop.f32.mrf.mxu1  ;;  %v890_v33 = vpop.f32.mrf.mxu0 }
 0x1b5   : > { %v2888_v40 = vadd.f32 %v750_v32, %v2873_v25  ;;  %v2891_v41 = vadd.f32 %v890_v33, %v2873_v25 }
 0x1b6   : > { %v2368_v35 = vpop.f32.mrf.mxu1  ;;  %v2386_v36 = vpop.f32.mrf.mxu0 }
 0x1b7   : > { %v2912_v53 = vadd.f32 %v2368_v35, %v2879_v28  ;;  %v2915_v54 = vadd.f32 %v2386_v36, %v2879_v28 }
 0x1b8   : > { %v753_v37 = vpop.f32.mrf.mxu1  ;;  %v893_v38 = vpop.f32.mrf.mxu0 }
 0x1b9   : > { %v2894_v42 = vadd.f32 %v753_v37, %v2875_v26  ;;  %v2897_v43 = vadd.f32 %v893_v38, %v2875_v26 }
 0x1ba   : > { %v2371_v44 = vpop.f32.mrf.mxu1  ;;  %v2389_v45 = vpop.f32.mrf.mxu0 }
 0x1bb   : > { %v1237_v49 = vmax.f32 %v2888_v40, %v2894_v42  ;;  %v1258_v50 = vmax.f32 %v2891_v41, %v2897_v43  ;;  %v2944_v9 = vadd.f32 %v2371_v44, %v2885_v39  ;;  %v2947_v10 = vadd.f32 %v2389_v45, %v2885_v39 }
 0x1bc   : > { %v766_v51 = vpop.f32.mrf.mxu1  ;;  %v906_v52 = vpop.f32.mrf.mxu0 }
 0x1bd   : > { %v1238_v55 = vmax.f32 %v1237_v49, %v2902_v47  ;;  %v1259_v56 = vmax.f32 %v1258_v50, %v2905_v48  ;;  %v2922_v60 = vadd.f32 %v766_v51, %v2881_v31  ;;  %v2926_v62 = vadd.f32 %v906_v52, %v2881_v31  ;;  %v2979_v50 = vpop.permute.xlu0 %653 }
 0x1be   : > { %v2372_v57 = vpop.f32.mrf.mxu1  ;;  %v2390_v58 = vpop.f32.mrf.mxu0  ;;  %3644 = vst [vmem:[#allocation6_spill] sm:$0xff] %v2979_v50 }
 0x1bf   : > { %v1239_v61 = vmax.f32 %v1238_v55, %v2912_v53  ;;  %v1260_v63 = vmax.f32 %v1259_v56, %v2915_v54  ;;  %v2954_v16 = vadd.f32 %v2372_v57, %v2899_v46  ;;  %v2957_v17 = vadd.f32 %v2390_v58, %v2899_v46 }
 0x1c0   : > { %v769_v0 = vpop.f32.mrf.mxu1  ;;  %v909_v1 = vpop.f32.mrf.mxu0 }
 0x1c1   : > { %v1240_v3 = vmax.f32 %v1239_v61, %v2922_v60  ;;  %v1261_v4 = vmax.f32 %v1260_v63, %v2926_v62  ;;  %v2938_v5 = vadd.f32 %v769_v0, %v2883_v34  ;;  %v2941_v6 = vadd.f32 %v909_v1, %v2883_v34  ;;  %v2989_v61 = vpop.permute.xlu1 %658 }
 0x1c2   : > { %v2375_v7 = vpop.f32.mrf.mxu1  ;;  %v2393_v8 = vpop.f32.mrf.mxu0  ;;  %3645 = vst [vmem:[#allocation7_spill] sm:$0xff] %v2989_v61 }
 0x1c3   : > { %v1241_v11 = vmax.f32 %v1240_v3, %v2938_v5  ;;  %v1262_v12 = vmax.f32 %v1261_v4, %v2941_v6  ;;  %v2982_v51 = vadd.f32 %v2375_v7, %v2951_v15  ;;  %v2985_v52 = vadd.f32 %v2393_v8, %v2951_v15 }
 0x1c4   : > { %v782_v13 = vpop.f32.mrf.mxu1  ;;  %v922_v14 = vpop.f32.mrf.mxu0 }
 0x1c5   : > { %v1242_v18 = vmax.f32 %v1241_v11, %v2944_v9  ;;  %v1263_v19 = vmax.f32 %v1262_v12, %v2947_v10  ;;  %v2964_v23 = vadd.f32 %v782_v13, %v2919_v59  ;;  %v2968_v30 = vadd.f32 %v922_v14, %v2919_v59 }
 0x1c6   : > { %v2376_v20 = vpop.f32.mrf.mxu1  ;;  %v2394_v21 = vpop.f32.mrf.mxu0 }
 0x1c7   : > { %v1243_v29 = vmax.f32 %v1242_v18, %v2954_v16  ;;  %v1264_v32 = vmax.f32 %v1263_v19, %v2957_v17  ;;  %v2992_v63 = vadd.f32 %v2376_v20, %v2961_v22  ;;  %v2995_v0 = vadd.f32 %v2394_v21, %v2961_v22  ;;  %v3007_v19 = vpop.permute.xlu0 %663 }
 0x1c8   : > { %v785_v33 = vpop.f32.mrf.mxu1  ;;  %v925_v35 = vpop.f32.mrf.mxu0  ;;  %3646 = vst [vmem:[#allocation8_spill] sm:$0xff] %v3007_v19 }
 0x1c9   : > { %v1244_v36 = vmax.f32 %v1243_v29, %v2964_v23  ;;  %v1265_v37 = vmax.f32 %v1264_v32, %v2968_v30  ;;  %v2974_v38 = vadd.f32 %v785_v33, %v2933_v2  ;;  %v2977_v44 = vadd.f32 %v925_v35, %v2933_v2 }
 0x1ca   : > { %v2379_v45 = vpop.f32.mrf.mxu1  ;;  %v2397_v49 = vpop.f32.mrf.mxu0 }
 0x1cb   : > { %v1245_v55 = vmax.f32 %v1244_v36, %v2974_v38  ;;  %v1266_v56 = vmax.f32 %v1265_v37, %v2977_v44  ;;  %v3017_v36 = vpop.permute.xlu1 %668  ;;  %v3020_v37 = vadd.f32 %v2379_v45, %v3007_v19 }
 0x1cc   : > { %v798_v57 = vpop.f32.mrf.mxu1  ;;  %v938_v58 = vpop.f32.mrf.mxu0  ;;  %3648 = vst [vmem:[#allocation10_spill] sm:$0xff] %v3017_v36 }
 0x1cd   : > { %v1246_v1 = vmax.f32 %v1245_v55, %v2982_v51  ;;  %v1267_v3 = vmax.f32 %v1266_v56, %v2985_v52  ;;  %v3000_v8 = vadd.f32 %v798_v57, %v2979_v50  ;;  %v3004_v12 = vadd.f32 %v938_v58, %v2979_v50  ;;  %3649 = vst [vmem:[#allocation11_spill] sm:$0xff] %v3020_v37 }
 0x1ce   : > { %v2380_v4 = vpop.f32.mrf.mxu1  ;;  %v2398_v7 = vpop.f32.mrf.mxu0  ;;  %v3023_v55 = vadd.f32 %v2397_v49, %v3007_v19 }
 0x1cf   : > { %v1247_v11 = vmax.f32 %v1246_v1, %v2992_v63  ;;  %v1268_v13 = vmax.f32 %v1267_v3, %v2995_v0  ;;  %v3028_v3 = vadd.f32 %v2380_v4, %v3017_v36 }
 0x1d0   : > { %v801_v14 = vpop.f32.mrf.mxu1  ;;  %v941_v18 = vpop.f32.mrf.mxu0  ;;  %3650 = vst [vmem:[#allocation12_spill] sm:$0xff] %v3023_v55 }
 0x1d1   : > { %v1248_v20 = vmax.f32 %v1247_v11, %v3000_v8  ;;  %v1269_v21 = vmax.f32 %v1268_v13, %v3004_v12  ;;  %v3012_v29 = vadd.f32 %v801_v14, %v2989_v61  ;;  %v3015_v32 = vadd.f32 %v941_v18, %v2989_v61  ;;  %3651 = vst [vmem:[#allocation13_spill] sm:$0xff] %v3028_v3 }
 0x1d2   : > { %v2403_v33 = vpop.f32.mrf.mxu1  ;;  %v2421_v35 = vpop.f32.mrf.mxu0  ;;  %v3031_v11 = vadd.f32 %v2398_v7, %v3017_v36 }
 0x1d3   : > { %3647 = vst [vmem:[#allocation9_spill] sm:$0xff] %v3015_v32  ;;  %v1249_v56 = vmax.f32 %v1248_v20, %v3012_v29  ;;  %v1270_v57 = vmax.f32 %v1269_v21, %v3015_v32 }
 0x1d4   : > { %v1030_v58 = vpop.f32.mrf.mxu1  ;;  %v1170_v1 = vpop.f32.mrf.mxu0  ;;  %3652 = vst [vmem:[#allocation14_spill] sm:$0xff] %v3031_v11 }
 0x1d5   : > { %v1250_v13 = vmax.f32 %v1249_v56, %v3020_v37  ;;  %v1271_v45 = vmax.f32 %v1270_v57, %v3023_v55  ;;  %v3038_v21 = vadd.f32 %v1030_v58, %v2873_v25  ;;  %v3041_v24 = vadd.f32 %v1170_v1, %v2873_v25 }
 0x1d6   : > { %v2404_v14 = vpop.f32.mrf.mxu1  ;;  %v2422_v18 = vpop.f32.mrf.mxu0  ;;  %v1341_v55 = vlaneseq  ;;  %v3053_v58 = vadd.f32 %v2421_v35, %v2877_v27 }
 0x1d7   : > { %v1251_v49 = vmax.f32 %v1250_v13, %v3028_v3  ;;  %v1272_v20 = vmax.f32 %v1271_v45, %v3031_v11  ;;  %3653 = vst [vmem:[#allocation15_spill] sm:$0xff] %v3038_v21  ;;  %3654 = vst [vmem:[#allocation16_spill] sm:$0xff] %v3041_v24  ;;  %v3050_v13 = vadd.f32 %v2403_v33, %v2877_v27 }
 0x1d8   : > { %v1033_v4 = vpop.f32.mrf.mxu1  ;;  %v1173_v19 = vpop.f32.mrf.mxu0  ;;  %3657 = vst [vmem:[#allocation19_spill] sm:$0xff] %v3053_v58 }
 0x1d9   : > { %v1252_v7 = vrot.slane %v1251_v49, 4  ;;  %v1273_v36 = vrot.slane %v1272_v20, 4  ;;  %v3044_v56 = vadd.f32 %v1033_v4, %v2875_v26  ;;  %v3047_v57 = vadd.f32 %v1173_v19, %v2875_v26 }
 0x1da   : > { %v2407_v45 = vpop.f32.mrf.mxu1  ;;  %v2425_v25 = vpop.f32.mrf.mxu0  ;;  %v3060_v26 = vadd.f32 %v2404_v14, %v2879_v28  ;;  %v3063_v19 = vadd.f32 %v2422_v18, %v2879_v28 }
 0x1db   : > { %3655 = vst [vmem:[#allocation17_spill] sm:$0xff] %v3044_v56  ;;  %3656 = vst [vmem:[#allocation18_spill] sm:$0xff] %v3047_v57  ;;  %v1253_v1 = vmax.f32 %v1251_v49, %v1252_v7  ;;  %v1274_v11 = vmax.f32 %v1272_v20, %v1273_v36  ;;  %v1279_v61 = vmax.f32 %v3038_v21, %v3044_v56  ;;  %v1342_v49 = vshrl.u32 %v1341_v55, 7  ;;  %v3076_v55 = vld [vmem:[#allocation3] sm:$0x1] }
 0x1dc   : > { %v1300_v4 = vmax.f32 %v3041_v24, %v3047_v57  ;;  %3658 = vst [vmem:[#allocation20_spill] sm:$0xff] %v3063_v19  ;;  %v1046_v33 = vpop.f32.mrf.mxu1  ;;  %v1186_v3 = vpop.f32.mrf.mxu0 }
 0x1dd   : > { %v1254_v27 = vrot.slane %v1253_v1, 2  ;;  %v1275_v35 = vrot.slane %v1274_v11, 2  ;;  %v1280_v37 = vmax.f32 %v1279_v61, %v3050_v13  ;;  %v3068_v20 = vadd.f32 %v1046_v33, %v2881_v31 }
 0x1de   : > { %v1301_v36 = vmax.f32 %v1300_v4, %v3053_v58  ;;  %v2408_v7 = vpop.f32.mrf.mxu1  ;;  %v2426_v57 = vpop.f32.mrf.mxu0  ;;  %v3074_v4 = vadd.f32 %v1186_v3, %v2881_v31  ;;  %v3078_v33 = vsub.s32 0, %v1342_v49  ;;  %v3080_v58 = vld [vmem:[#allocation3 + $0x1] sm:$0x1] }
 0x1df   : > { %v1255_v24 = vmax.f32 %v1253_v1, %v1254_v27  ;;  %v1276_v14 = vmax.f32 %v1274_v11, %v1275_v35  ;;  %v1281_v56 = vmax.f32 %v1280_v37, %v3060_v26  ;;  %3661 = vst [vmem:[#allocation23_spill] sm:$0xff] %v3080_v58 }
 0x1e0   : > { %v1302_v28 = vmax.f32 %v1301_v36, %v3063_v19  ;;  %v1049_v18 = vpop.f32.mrf.mxu1  ;;  %v1189_v21 = vpop.f32.mrf.mxu0  ;;  %3659 = vst [vmem:[#allocation21_spill] sm:$0xff] %v3074_v4  ;;  %3660 = vst [vmem:[#allocation22_spill] sm:$0xff] %v3078_v33 }
 0x1e1   : > { %v1256_v50 = vrot.slane %v1255_v24, 1  ;;  %v1277_v32 = vrot.slane %v1276_v14, 1  ;;  %v1282_v61 = vmax.f32 %v1281_v56, %v3068_v20  ;;  %v3083_v11 = vadd.f32 %v1049_v18, %v2883_v34 }
 0x1e2   : > { %v3085_v37 = vpop.f32.mrf.mxu1  ;;  %v3087_v1 = vpop.f32.mrf.mxu0  ;;  %v1303_v56 = vmax.f32 %v1302_v28, %v3074_v4  ;;  %v3091_v31 = vadd.f32 %v1189_v21, %v2883_v34  ;;  %v3114_v34 = vadd.f32 %v2425_v25, %v2885_v39  ;;  %v3118_v21 = vadd.f32 %v2408_v7, %v2899_v46 }
 0x1e3   : > { %v1257_v27 = vmax.f32 %v1255_v24, %v1256_v50  ;;  %v1278_v35 = vmax.f32 %v1276_v14, %v1277_v32  ;;  %v1283_v3 = vmax.f32 %v1282_v61, %v3083_v11  ;;  %v3105_v24 = vadd.f32 %v2407_v45, %v2885_v39 }
 0x1e4   : > { %3662 = vst [vmem:[#allocation24_spill] sm:$0xff] %v3091_v31  ;;  %v3094_v36 = vpop.f32.mrf.mxu1  ;;  %v3102_v19 = vpop.f32.mrf.mxu0  ;;  %v1304_v32 = vmax.f32 %v1303_v56, %v3091_v31  ;;  %v3157_v31 = vadd.f32 %v2426_v57, %v2899_v46 }
 0x1e5   : > { %v3097_v49 = vmax.f32 %v3076_v55, %v1257_v27  ;;  %v3100_v18 = vmax.f32 %v3080_v58, %v1278_v35  ;;  %3664 = vst [vmem:[#allocation26_spill] sm:$0xff] %v3105_v24  ;;  %v3121_v14 = vmax.f32 %v1283_v3, %v3105_v24 }
 0x1e6   : > { %v3123_v45 = vpop.f32.mrf.mxu1  ;;  %v3137_v35 = vpop.f32.mrf.mxu0 }
 0x1e7   : > { %3663 = vst [vmem:[#allocation25_spill] sm:$0xff] %v3100_v18  ;;  %v3109_v50 = vrot.slane %v3097_v49, %v3078_v33  ;;  %1917 = vst [vmem:[#allocation3] sm:$0x1] %v3097_v49  ;;  %v3153_v61 = vrot.slane %v3100_v18, %v3078_v33 }
 0x1e8   : > { %1918 = vst [vmem:[#allocation3 + $0x1] sm:$0x1] %v3100_v18  ;;  %v1205_v24 = vpop.f32.mrf.mxu0 }
 0x1e9   : > { %v1361_v39 = vsub.f32 %v2888_v40, %v3109_v50  ;;  %v1362_v25 = vsub.f32 %v2894_v42, %v3109_v50  ;;  %v1363_v7 = vsub.f32 %v2902_v47, %v3109_v50  ;;  %v1364_v27 = vsub.f32 %v2912_v53, %v3109_v50 }
 0x1ea   : > { %v1365_v56 = vsub.f32 %v2922_v60, %v3109_v50  ;;  %v1366_v3 = vsub.f32 %v2938_v5, %v3109_v50  ;;  %v1367_v40 = vsub.f32 %v2944_v9, %v3109_v50  ;;  %v1368_v42 = vsub.f32 %v2954_v16, %v3109_v50  ;;  %v1065_v9 = vpop.f32.mrf.mxu1 }
 0x1eb   : > { %v1369_v47 = vsub.f32 %v2964_v23, %v3109_v50  ;;  %v1370_v53 = vsub.f32 %v2974_v38, %v3109_v50  ;;  %v1305_v60 = vmax.f32 %v1304_v32, %v3114_v34  ;;  %v1425_v28 = vpack.c.bf16 %v1362_v25, %v1361_v39 }
 0x1ec   : > { %v1426_v5 = vpack.c.bf16 %v1364_v27, %v1363_v7  ;;  %v1427_v4 = vpack.c.bf16 %v1366_v3, %v1365_v56  ;;  %v1428_v16 = vpack.c.bf16 %v1368_v42, %v1367_v40  ;;  %v1285_v23 = vmax.f32 %v3121_v14, %v3118_v21  ;;  %v3184_v27 = vpop.f32.mrf.mxu0 }
 0x1ed   : > { %v1429_v58 = vpack.c.bf16 %v1370_v53, %v1369_v47  ;;  %v1371_v38 = vsub.f32 %v2982_v51, %v3109_v50  ;;  %v1372_v18 = vsub.f32 %v2992_v63, %v3109_v50  ;;  %v1458_v32 = vmul.bf16 1069105081, %v1425_v28  ;;  %v3176_v28 = vpop.f32.mrf.mxu1 }
 0x1ee   : > { %v1461_v39 = vmul.bf16 1069105081, %v1426_v5  ;;  %v1373_v46 = vsub.f32 %v3000_v8, %v3109_v50  ;;  %v1374_v57 = vsub.f32 %v3012_v29, %v3109_v50  ;;  %v1377_v25 = vsub.f32 %v2891_v41, %v3153_v61 }
 0x1ef   : > { %v1306_v14 = vmax.f32 %v1305_v60, %v3157_v31  ;;  %2563 = vpow.bf16 %v1458_v32  ;;  %v1464_v7 = vmul.bf16 1069105081, %v1427_v4  ;;  %v1378_v51 = vsub.f32 %v2897_v43, %v3153_v61  ;;  %v1078_v42 = vpop.f32.mrf.mxu1  ;;  %v1218_v60 = vpop.f32.mrf.mxu0 }
 0x1f0   : > { %v1379_v63 = vsub.f32 %v2905_v48, %v3153_v61  ;;  %2565 = vpow.bf16 %v1461_v39  ;;  %v1380_v8 = vsub.f32 %v2915_v54, %v3153_v61  ;;  %v1381_v29 = vsub.f32 %v2926_v62, %v3153_v61 }
 0x1f1   : > { %v1382_v41 = vsub.f32 %v2941_v6, %v3153_v61  ;;  %v1430_v4 = vpack.c.bf16 %v1372_v18, %v1371_v38  ;;  %v1383_v43 = vsub.f32 %v2947_v10, %v3153_v61  ;;  %v1384_v48 = vsub.f32 %v2957_v17, %v3153_v61  ;;  %v2416_v39 = vpop.f32.mrf.mxu1 }
 0x1f2   : > { %v1385_v56 = vsub.f32 %v2968_v30, %v3153_v61  ;;  %v1467_v3 = vmul.bf16 1069105081, %v1428_v16  ;;  %v1386_v54 = vsub.f32 %v2977_v44, %v3153_v61  ;;  %v1387_v62 = vsub.f32 %v2985_v52, %v3153_v61 }
 0x1f3   : > { %v1388_v6 = vsub.f32 %v2995_v0, %v3153_v61  ;;  %v1431_v18 = vpack.c.bf16 %v1374_v57, %v1373_v46  ;;  %2567 = vpow.bf16 %v1464_v7  ;;  %v1470_v40 = vmul.bf16 1069105081, %v1429_v58 }
 0x1f4   : > { %v1433_v10 = vpack.c.bf16 %v1378_v51, %v1377_v25  ;;  %v1434_v47 = vpack.c.bf16 %v1380_v8, %v1379_v63  ;;  %v1435_v17 = vpack.c.bf16 %v1382_v41, %v1381_v29  ;;  %v1436_v53 = vpack.c.bf16 %v1384_v48, %v1383_v43  ;;  %v3667_v43 = vld [vmem:[#allocation11_spill] sm:$0xff] }
 0x1f5   : > { %v3200_v30 = vadd.f32 %v3094_v36, %v2919_v59  ;;  %v1473_v44 = vmul.bf16 1069105081, %v1430_v4  ;;  %v3202_v5 = vpack.c.bf16 %v1386_v54, %v1385_v56  ;;  %v3204_v52 = vpack.c.bf16 %v1388_v6, %v1387_v62  ;;  %v3669_v6 = vld [vmem:[#allocation7_spill] sm:$0xff] }
 0x1f6   : > { %v3208_v0 = vadd.f32 %v3102_v19, %v2919_v59  ;;  %2569 = vpow.bf16 %v1467_v3  ;;  %v1482_v58 = vmul.bf16 1069105081, %v1433_v10  ;;  %v1485_v16 = vmul.bf16 1069105081, %v1434_v47  ;;  %v2434_v59 = vpop.f32.mrf.mxu0 }
 0x1f7   : > { %v1286_v38 = vmax.f32 %v1285_v23, %v3200_v30  ;;  %2571 = vpow.bf16 %v1470_v40  ;;  %v1476_v32 = vmul.bf16 1069105081, %v1431_v18  ;;  %v1488_v46 = vmul.bf16 1069105081, %v1435_v17 }
 0x1f8   : > { %v1307_v36 = vmax.f32 %v1306_v14, %v3208_v0  ;;  %2573 = vpow.bf16 %v1482_v58  ;;  %v3213_v57 = vadd.f32 %v1065_v9, %v2933_v2  ;;  %v3216_v25 = vadd.f32 %v1205_v24, %v2933_v2  ;;  %v1221_v8 = vpop.f32.mrf.mxu0 }
 0x1f9   : > { %2575 = vpow.bf16 %v1485_v16  ;;  %v3220_v19 = vadd.f32 %v3085_v37, %v2951_v15  ;;  %v3224_v23 = vadd.f32 %v3087_v1, %v2951_v15  ;;  %v3228_v14 = vadd.f32 %v3123_v45, %v2961_v22  ;;  %v3665_v37 = vld [vmem:[#allocation9_spill] sm:$0xff]  ;;  %v1081_v1 = vpop.f32.mrf.mxu1 }
 0x1fa   : > { %2577 = vpow.bf16 %v1473_v44  ;;  %v1287_v9 = vmax.f32 %v1286_v38, %v3213_v57  ;;  %v1308_v2 = vmax.f32 %v1307_v36, %v3216_v25  ;;  %v1389_v24 = vsub.f32 %v3004_v12, %v3153_v61  ;;  %v3666_v12 = vld [vmem:[#allocation6_spill] sm:$0xff]  ;;  %v3670_v36 = vld [vmem:[#allocation8_spill] sm:$0xff] }
 0x1fb   : > { %2579 = vpow.bf16 %v1476_v32  ;;  %v1390_v7 = vsub.f32 %v3665_v37, %v3153_v61  ;;  %v3238_v15 = vadd.f32 %v3137_v35, %v2961_v22  ;;  %v1491_v51 = vmul.bf16 1069105081, %v1436_v53  ;;  %v3668_v22 = vld [vmem:[#allocation13_spill] sm:$0xff]  ;;  %v3671_v37 = vld [vmem:[#allocation10_spill] sm:$0xff] }
 0x1fc   : > { %2581 = vpow.bf16 %v1488_v46  ;;  %v1288_v45 = vmax.f32 %v1287_v9, %v3220_v19  ;;  %v1309_v63 = vmax.f32 %v1308_v2, %v3224_v23  ;;  %v1494_v41 = vmul.bf16 1069105081, %v3202_v5 }
 0x1fd   : > { %v3242_v29 = vpop.eup %2563  ;;  %v3246_v4 = vadd.f32 %v1078_v42, %v3666_v12  ;;  %v1375_v48 = vsub.f32 %v3667_v43, %v3109_v50  ;;  %v1376_v35 = vsub.f32 %v3668_v22, %v3109_v50  ;;  %v3258_v18 = vadd.f32 %v1081_v1, %v3669_v6  ;;  %v3673_v22 = vld [vmem:[#allocation14_spill] sm:$0xff] }
 0x1fe   : > { %v3252_v56 = vpop.eup %2565  ;;  %v1561_v3 = vunpack.c.l.bf16 %v3242_v29  ;;  %v1562_v54 = vunpack.c.h.bf16 %v3242_v29  ;;  %v1289_v62 = vmax.f32 %v1288_v45, %v3228_v14  ;;  %v3261_v40 = vadd.f32 %v1218_v60, %v3666_v12 }
 0x1ff   : > { %v1310_v10 = vmax.f32 %v1309_v63, %v3238_v15  ;;  %v3265_v42 = vadd.f32 %v1221_v8, %v3669_v6  ;;  %v1432_v50 = vpack.c.bf16 %v1376_v35, %v1375_v48  ;;  %v1563_v47 = vunpack.c.l.bf16 %v3252_v56  ;;  %v3672_v63 = vld [vmem:[#allocation12_spill] sm:$0xff] }
 0x200   : > { %v1625_v17 = vadd.f32 %v1562_v54, %v1561_v3  ;;  %2583 = vpow.bf16 %v1491_v51  ;;  %v1290_v53 = vmax.f32 %v1289_v62, %v3246_v4  ;;  %v1439_v5 = vpack.c.bf16 %v1390_v7, %v1389_v24 }
 0x201   : > { %v3269_v44 = vpop.eup %2567  ;;  %v1497_v58 = vmul.bf16 1069105081, %v3204_v52  ;;  %v1311_v60 = vmax.f32 %v1310_v10, %v3261_v40  ;;  %v1479_v16 = vmul.bf16 1069105081, %v1432_v50  ;;  %v1564_v38 = vunpack.c.h.bf16 %v3252_v56 }
 0x202   : > { %v1626_v32 = vadd.f32 %v1625_v17, %v1563_v47  ;;  %v3276_v46 = vadd.f32 %v3176_v28, %v3670_v36  ;;  %v1291_v9 = vmax.f32 %v1290_v53, %v3258_v18  ;;  %v3281_v2 = vadd.f32 %v3184_v27, %v3670_v36 }
 0x203   : > { %v3284_v24 = vadd.f32 %v2416_v39, %v3671_v37  ;;  %v1312_v52 = vmax.f32 %v1311_v60, %v3265_v42  ;;  %2585 = vpow.bf16 %v1479_v16  ;;  %v1565_v1 = vunpack.c.l.bf16 %v3269_v44 }
 0x204   : > { %v3287_v7 = vpop.eup %2569  ;;  %v1627_v51 = vadd.f32 %v1626_v32, %v1564_v38  ;;  %2587 = vpow.bf16 %v1494_v41  ;;  %v1292_v28 = vmax.f32 %v1291_v9, %v3276_v46  ;;  %v3294_v27 = vadd.f32 %v2434_v59, %v3671_v37 }
 0x205   : > { %v3291_v45 = vpop.eup %2571  ;;  %2589 = vpow.bf16 %v1497_v58  ;;  %v1313_v39 = vmax.f32 %v1312_v52, %v3281_v2  ;;  %v1391_v8 = vsub.f32 %v3672_v63, %v3153_v61  ;;  %v1566_v43 = vunpack.c.h.bf16 %v3269_v44 }
 0x206   : > { %v3299_v12 = vpop.eup %2573  ;;  %v1628_v48 = vadd.f32 %v1627_v51, %v1565_v1  ;;  %v1293_v41 = vmax.f32 %v1292_v28, %v3284_v24  ;;  %v1392_v35 = vsub.f32 %v3673_v22, %v3153_v61  ;;  %v1567_v10 = vunpack.c.l.bf16 %v3287_v7 }
 0x207   : > { %v3305_v3 = vpop.eup %2575  ;;  %v1577_v59 = vunpack.c.l.bf16 %v3299_v12  ;;  %v1578_v54 = vunpack.c.h.bf16 %v3299_v12  ;;  %v1314_v62 = vmax.f32 %v1313_v39, %v3294_v27  ;;  %v1500_v53 = vmul.bf16 1069105081, %v1439_v5 }
 0x208   : > { %v3310_v6 = vpop.eup %2577  ;;  %v1629_v50 = vadd.f32 %v1628_v48, %v1566_v43  ;;  %v1294_v47 = vrot.slane %v1293_v41, 4  ;;  %v1579_v58 = vunpack.c.l.bf16 %v3305_v3  ;;  %v1568_v38 = vunpack.c.h.bf16 %v3287_v7 }
 0x209   : > { %v3313_v17 = vpop.eup %2579  ;;  %v1646_v61 = vadd.f32 %v1578_v54, %v1577_v59  ;;  %v1315_v60 = vrot.slane %v1314_v62, 4  ;;  %v1440_v9 = vpack.c.bf16 %v1392_v35, %v1391_v8  ;;  %v1580_v37 = vunpack.c.h.bf16 %v3305_v3 }
 0x20a   : > { %v3316_v16 = vpop.eup %2581  ;;  %v1630_v32 = vadd.f32 %v1629_v50, %v1567_v10  ;;  %v1295_v36 = vmax.f32 %v1293_v41, %v1294_v47  ;;  %v1569_v51 = vunpack.c.l.bf16 %v3291_v45  ;;  %2591 = vpow.bf16 %v1500_v53 }
 0x20b   : > { %v1647_v52 = vadd.f32 %v1646_v61, %v1579_v58  ;;  %v1316_v1 = vmax.f32 %v1314_v62, %v1315_v60  ;;  %v1581_v5 = vunpack.c.l.bf16 %v3316_v16  ;;  %v1570_v22 = vunpack.c.h.bf16 %v3291_v45  ;;  %v3329_v61 = vld [vmem:[#allocation3 + $0x2] sm:$0x1] }
 0x20c   : > { %v1631_v28 = vadd.f32 %v1630_v32, %v1568_v38  ;;  %v1296_v39 = vrot.slane %v1295_v36, 2  ;;  %v1503_v8 = vmul.bf16 1069105081, %v1440_v9  ;;  %v1582_v35 = vunpack.c.h.bf16 %v3316_v16 }
 0x20d   : > { %v1648_v63 = vadd.f32 %v1647_v52, %v1580_v37  ;;  %v1317_v43 = vrot.slane %v1316_v1, 2 }
 0x20e   : > { %v3322_v48 = vpop.eup %2583  ;;  %v1632_v59 = vadd.f32 %v1631_v28, %v1569_v51  ;;  %v1297_v41 = vmax.f32 %v1295_v36, %v1296_v39  ;;  %2593 = vpow.bf16 %v1503_v8  ;;  %v3333_v36 = vld [vmem:[#allocation3 + $0x3] sm:$0x1]  ;;  %v3675_v51 = vmov 0.0  }
 0x20f   : > { %v1649_v54 = vadd.f32 %v1648_v63, %v1581_v5  ;;  %v1318_v62 = vmax.f32 %v1316_v1, %v1317_v43  ;;  %v1583_v53 = vunpack.c.l.bf16 %v3322_v48  ;;  %3674 = vst [vmem:[#allocation9_spill] sm:$0xff] %v3333_v36  ;;  %v1584_v37 = vunpack.c.h.bf16 %v3322_v48 }
 0x210   : > { %v1633_v10 = vadd.f32 %v1632_v59, %v1570_v22  ;;  %v1298_v50 = vrot.slane %v1297_v41, 1  ;;  %v1571_v28 = vunpack.c.l.bf16 %v3310_v6  ;;  %v1572_v22 = vunpack.c.h.bf16 %v3310_v6 }
 0x211   : > { %v3326_v47 = vpop.eup %2585  ;;  %v1650_v58 = vadd.f32 %v1649_v54, %v1582_v35  ;;  %v1319_v60 = vrot.slane %v1318_v62, 1  ;;  %v1573_v59 = vunpack.c.l.bf16 %v3313_v17 }
 0x212   : > { %v3331_v38 = vpop.eup %2587  ;;  %v1299_v32 = vmax.f32 %v1297_v41, %v1298_v50  ;;  %2436 = vmatpush3.bf16.msra.mxu1 %v3326_v47  ;;  %v1634_v41 = vadd.f32 %v1633_v10, %v1571_v28  ;;  %v3677_v10 = vsub.f32 %v3076_v55, %v3097_v49 }
 0x213   : > { %v3336_v9 = vpop.eup %2589  ;;  %v1651_v52 = vadd.f32 %v1650_v58, %v1583_v53  ;;  %v1320_v1 = vmax.f32 %v1318_v62, %v1319_v60  ;;  %2437 = vmatprep.subr.bf16.mxu1 %v3675_v51  ;;  %v1585_v5 = vunpack.c.l.bf16 %v3331_v38  ;;  %v1586_v35 = vunpack.c.h.bf16 %v3331_v38  ;;  %v3678_v58 = vld [vmem:[#allocation15_spill] sm:$0xff] }
 0x214   : > { %v3342_v39 = vmax.f32 %v3329_v61, %v1299_v32  ;;  %v1587_v54 = vunpack.c.l.bf16 %v3336_v9  ;;  %v1329_v50 = vmul.f32 1.442695, %v3677_v10  ;;  %v1588_v53 = vunpack.c.h.bf16 %v3336_v9  ;;  %v3679_v32 = vld [vmem:[#allocation17_spill] sm:$0xff] }
 0x215   : > { %v1652_v63 = vadd.f32 %v1651_v52, %v1584_v37  ;;  %v3346_v43 = vmax.f32 %v3333_v36, %v1320_v1  ;;  %v1635_v49 = vadd.f32 %v1634_v41, %v1572_v22 }
 0x216   : > { %v3352_v8 = vrot.slane %v3342_v39, %v3078_v33  ;;  %1919 = vst [vmem:[#allocation3 + $0x2] sm:$0x1] %v3342_v39  ;;  %2438 = vmatpush3.bf16.msra.mxu1 %v3313_v17  ;;  %2595 = vpow2.f32 %v1329_v50 }
 0x217   : > { %3676 = vst [vmem:[#allocation6_spill] sm:$0xff] %v3346_v43  ;;  %v1653_v62 = vadd.f32 %v1652_v63, %v1585_v5  ;;  %1920 = vst [vmem:[#allocation3 + $0x3] sm:$0x1] %v3346_v43  ;;  %2439 = vmatprep.subr.bf16.mxu1 %v3675_v51  ;;  %v3680_v63 = vld [vmem:[#allocation26_spill] sm:$0xff] }
 0x218   : > { %v1393_v60 = vsub.f32 %v3678_v58, %v3352_v8  ;;  %v1394_v37 = vsub.f32 %v3679_v32, %v3352_v8  ;;  %v1395_v52 = vsub.f32 %v3050_v13, %v3352_v8  ;;  %v1396_v28 = vsub.f32 %v3060_v26, %v3352_v8  ;;  %v3385_v26 = vpop.eup %2591 }
 0x219   : > { %v1654_v1 = vadd.f32 %v1653_v62, %v1586_v35  ;;  %v1397_v5 = vsub.f32 %v3068_v20, %v3352_v8  ;;  %v1398_v55 = vsub.f32 %v3083_v11, %v3352_v8  ;;  %v1399_v10 = vsub.f32 %v3680_v63, %v3352_v8  ;;  %v3682_v63 = vld [vmem:[#allocation25_spill] sm:$0xff] }
 0x21a   : > { %v1400_v58 = vsub.f32 %v3118_v21, %v3352_v8  ;;  %v3382_v13 = vrot.slane %v3346_v43, %v3078_v33  ;;  %2440 = vmatpush3.bf16.msra.mxu1 %v3310_v6  ;;  %v1401_v20 = vsub.f32 %v3200_v30, %v3352_v8  ;;  %v1402_v11 = vsub.f32 %v3213_v57, %v3352_v8 }
 0x21b   : > { %v1655_v35 = vadd.f32 %v1654_v1, %v1587_v54  ;;  %v1403_v22 = vsub.f32 %v3220_v19, %v3352_v8  ;;  %2441 = vmatprep.subr.bf16.mxu1 %v3675_v51  ;;  %v1404_v21 = vsub.f32 %v3228_v14, %v3352_v8  ;;  %v1441_v41 = vpack.c.bf16 %v1394_v37, %v1393_v60  ;;  %v3681_v1 = vld [vmem:[#allocation23_spill] sm:$0xff] }
 0x21c   : > { %v1442_v62 = vpack.c.bf16 %v1396_v28, %v1395_v52  ;;  %v1443_v6 = vpack.c.bf16 %v1398_v55, %v1397_v5  ;;  %v1574_v32 = vunpack.c.h.bf16 %v3313_v17  ;;  %v1405_v30 = vsub.f32 %v3246_v4, %v3352_v8  ;;  %v3402_v36 = vpop.eup %2593  ;;  %v3686_v5 = vld [vmem:[#allocation19_spill] sm:$0xff] }
 0x21d   : > { %v1656_v54 = vadd.f32 %v1655_v35, %v1588_v53  ;;  %v3683_v57 = vsub.f32 %v3681_v1, %v3682_v63  ;;  %v1406_v19 = vsub.f32 %v3258_v18, %v3352_v8  ;;  %v1444_v43 = vpack.c.bf16 %v1400_v58, %v1399_v10  ;;  %2456 = vmatpush3.bf16.msra.mxu0 %v3402_v36  ;;  %v3684_v18 = vld [vmem:[#allocation16_spill] sm:$0xff]  ;;  %v3688_v35 = vld [vmem:[#allocation21_spill] sm:$0xff] }
 0x21e   : > { %v1506_v14 = vmul.bf16 1069105081, %v1441_v41  ;;  %v1509_v60 = vmul.bf16 1069105081, %v1442_v62  ;;  %2442 = vmatpush3.bf16.msra.mxu1 %v3291_v45  ;;  %v1636_v37 = vadd.f32 %v1635_v49, %v1573_v59  ;;  %v1589_v17 = vunpack.c.l.bf16 %v3385_v26  ;;  %2457 = vmatprep.subr.bf16.mxu0 %v3675_v51  ;;  %v3685_v45 = vld [vmem:[#allocation18_spill] sm:$0xff]  ;;  %v3687_v49 = vld [vmem:[#allocation20_spill] sm:$0xff] }
 0x21f   : > { %v1331_v33 = vmul.f32 1.442695, %v3683_v57  ;;  %v1445_v53 = vpack.c.bf16 %v1402_v11, %v1401_v20  ;;  %2443 = vmatprep.subr.bf16.mxu1 %v3675_v51  ;;  %v3410_v4 = vpack.c.bf16 %v1404_v21, %v1403_v22  ;;  %v1512_v52 = vmul.bf16 1069105081, %v1443_v6  ;;  %v3689_v11 = vld [vmem:[#allocation24_spill] sm:$0xff] }
 0x220   : > { %2597 = vpow.bf16 %v1506_v14  ;;  %v1409_v28 = vsub.f32 %v3684_v18, %v3382_v13  ;;  %v1410_v59 = vsub.f32 %v3685_v45, %v3382_v13  ;;  %v1411_v55 = vsub.f32 %v3686_v5, %v3382_v13  ;;  %v571_v18 = vld [vmem:[%s3469_s18] sm:$0xf] }
 0x221   : > { %2599 = vpow.bf16 %v1509_v60  ;;  %v1412_v10 = vsub.f32 %v3687_v49, %v3382_v13  ;;  %v3421_v50 = vpack.c.bf16 %v1406_v19, %v1405_v30  ;;  %v1515_v58 = vmul.bf16 1069105081, %v1444_v43  ;;  %2458 = vmatpush3.bf16.msra.mxu0 %v3385_v26 }
 0x222   : > { %v1413_v20 = vsub.f32 %v3688_v35, %v3382_v13  ;;  %v1414_v22 = vsub.f32 %v3689_v11, %v3382_v13  ;;  %2444 = vmatpush3.bf16.msra.mxu1 %v3287_v7  ;;  %v1590_v21 = vunpack.c.h.bf16 %v3385_v26  ;;  %v1415_v41 = vsub.f32 %v3114_v34, %v3382_v13  ;;  %2459 = vmatprep.subr.bf16.mxu0 %v3675_v51 }
 0x223   : > { %v1416_v62 = vsub.f32 %v3157_v31, %v3382_v13  ;;  %2445 = vmatprep.subr.bf16.mxu1 %v3675_v51  ;;  %2601 = vpow2.f32 %v1331_v33  ;;  %v1518_v43 = vmul.bf16 1069105081, %v1445_v53  ;;  %v1575_v6 = vunpack.c.l.bf16 %v3326_v47 }
 0x224   : > { %2603 = vpow.bf16 %v1512_v52  ;;  %v1576_v7 = vunpack.c.h.bf16 %v3326_v47  ;;  %v1637_v30 = vadd.f32 %v1636_v37, %v1574_v32  ;;  %v1657_v1 = vadd.f32 %v1656_v54, %v1589_v17 }
 0x225   : > { %v1449_v63 = vpack.c.bf16 %v1410_v59, %v1409_v28  ;;  %v1450_v34 = vpack.c.bf16 %v1412_v10, %v1411_v55  ;;  %2605 = vpow.bf16 %v1515_v58  ;;  %v1521_v31 = vmul.bf16 1069105081, %v3410_v4  ;;  %2460 = vmatpush3.bf16.msra.mxu0 %v3336_v9 }
 0x226   : > { %v1524_v26 = vmul.bf16 1069105081, %v3421_v50  ;;  %v1451_v57 = vpack.c.bf16 %v1414_v22, %v1413_v20  ;;  %2446 = vmatpush3.bf16.msra.mxu1 %v3269_v44  ;;  %v1417_v33 = vsub.f32 %v3208_v0, %v3382_v13  ;;  %v1452_v19 = vpack.c.bf16 %v1416_v62, %v1415_v41  ;;  %2461 = vmatprep.subr.bf16.mxu0 %v3675_v51 }
 0x227   : > { %v1530_v14 = vmul.bf16 1069105081, %v1449_v63  ;;  %v1533_v60 = vmul.bf16 1069105081, %v1450_v34  ;;  %2447 = vmatprep.subr.bf16.mxu1 %v3675_v51  ;;  %2607 = vpow.bf16 %v1518_v43  ;;  %v1418_v47 = vsub.f32 %v3216_v25, %v3382_v13 }
 0x228   : > { %v1421_v32 = vsub.f32 %v3261_v40, %v3382_v13  ;;  %v1407_v0 = vsub.f32 %v3276_v46, %v3352_v8  ;;  %v1422_v44 = vsub.f32 %v3265_v42, %v3382_v13  ;;  %v1536_v9 = vmul.bf16 1069105081, %v1451_v57  ;;  %v1553_v57 = vld [vmem:[#allocation4] sm:$0x1] }
 0x229   : > { %2609 = vpow.bf16 %v1530_v14  ;;  %v1408_v54 = vsub.f32 %v3284_v24, %v3352_v8  ;;  %v1658_v37 = vadd.f32 %v1657_v1, %v1590_v21  ;;  %v1423_v25 = vsub.f32 %v3281_v2, %v3382_v13  ;;  %2462 = vmatpush3.bf16.msra.mxu0 %v3331_v38  ;;  %v3471_v2 = vpop.eup %2595 }
 0x22a   : > { %2611 = vpow.bf16 %v1533_v60  ;;  %2448 = vmatpush3.bf16.msra.mxu1 %v3252_v56  ;;  %v1424_v40 = vsub.f32 %v3294_v27, %v3382_v13  ;;  %v1419_v46 = vsub.f32 %v3224_v23, %v3382_v13  ;;  %v1539_v17 = vmul.bf16 1069105081, %v1452_v19  ;;  %2463 = vmatprep.subr.bf16.mxu0 %v3675_v51 }
 0x22b   : > { %2449 = vmatprep.subr.bf16.mxu1 %v3675_v51  ;;  %v1448_v56 = vpack.c.bf16 %v1408_v54, %v1407_v0  ;;  %v1638_v42 = vadd.f32 %v1637_v30, %v1575_v6  ;;  %v1420_v24 = vsub.f32 %v3238_v15, %v3382_v13  ;;  %v1453_v27 = vpack.c.bf16 %v1418_v47, %v1417_v33 }
 0x22c   : > { %v1456_v23 = vpack.c.bf16 %v1424_v40, %v1423_v25  ;;  %v1591_v38 = vunpack.c.l.bf16 %v3402_v36  ;;  %v1455_v8 = vpack.c.bf16 %v1422_v44, %v1421_v32  ;;  %2613 = vpow.bf16 %v1536_v9 }
 0x22d   : > { %v1527_v53 = vmul.bf16 1069105081, %v1448_v56  ;;  %v1639_v4 = vadd.f32 %v1638_v42, %v1576_v7  ;;  %2615 = vpow.bf16 %v1521_v31  ;;  %v1592_v45 = vunpack.c.h.bf16 %v3402_v36  ;;  %2464 = vmatpush3.bf16.msra.mxu0 %v3322_v48 }
 0x22e   : > { %v3477_v52 = vpop.eup %2597  ;;  %2450 = vmatpush3.bf16.msra.mxu1 %v3242_v29  ;;  %v1551_v28 = vmul.bf16 1069105081, %v1456_v23  ;;  %v1659_v15 = vadd.f32 %v1658_v37, %v1591_v38  ;;  %2617 = vpow.bf16 %v1539_v17  ;;  %v1454_v29 = vpack.c.bf16 %v1420_v24, %v1419_v46  ;;  %2465 = vmatprep.subr.bf16.mxu0 %v3675_v51  ;;  %v1554_v37 = vld [vmem:[#allocation4 + $0x1] sm:$0x1]  ;;  %v572_v17 = vld [vmem:[%s3469_s18 + $0x4] sm:$0xf] }
 0x22f   : > { %v3482_v13 = vpop.eup %2599  ;;  %v1593_v59 = vunpack.c.l.bf16 %v3477_v52  ;;  %v1594_v5 = vunpack.c.h.bf16 %v3477_v52  ;;  %2475 = vmatprep.subr.bf16.mxu1 %v3675_v51  ;;  %v1640_v55 = vrot.slane %v1639_v4, 4  ;;  %v1542_v10 = vmul.bf16 1069105081, %v1453_v27 }
 0x230   : > { %v3488_v49 = vpop.eup %2601  ;;  %2619 = vpow.bf16 %v1527_v53  ;;  %v1660_v36 = vadd.f32 %v1659_v15, %v1592_v45  ;;  %v1595_v58 = vunpack.c.l.bf16 %v3482_v13  ;;  %v1548_v20 = vmul.bf16 1069105081, %v1455_v8 }
 0x231   : > { %v1667_v35 = vadd.f32 %v1594_v5, %v1593_v59  ;;  %2452 = vmatmul.mubr.bf16.vlgmr.msra.gmra.mxu1 %v571_v18  ;;  %2621 = vpow.bf16 %v1551_v28  ;;  %v1641_v48 = vadd.f32 %v1640_v55, %v1639_v4  ;;  %v1596_v21 = vunpack.c.h.bf16 %v3482_v13  ;;  %2466 = vmatpush3.bf16.msra.mxu0 %v3316_v16 }
 0x232   : > { %v3492_v11 = vpop.eup %2603  ;;  %2491 = vmatprep.mubr.msk.bf16.mxu1 %vm2670_vm3, %v3675_v51  ;;  %v1661_v22 = vrot.slane %v1660_v36, 4  ;;  %2623 = vpow.bf16 %v1524_v26  ;;  %2467 = vmatprep.subr.bf16.mxu0 %v3675_v51  ;;  %v1545_v1 = vmul.bf16 1069105081, %v1454_v29  ;;  %v1558_v4 = vmul.f32 %v3488_v49, %v1554_v37 }
 0x233   : > { %v1668_v41 = vadd.f32 %v1667_v35, %v1595_v58  ;;  %v3500_v62 = vpop.eup %2605  ;;  %2625 = vpow.bf16 %v1542_v10  ;;  %v1642_v43 = vrot.slane %v1641_v48, 2  ;;  %v1597_v7 = vunpack.c.l.bf16 %v3492_v11 }
 0x234   : > { %v1662_v6 = vadd.f32 %v1661_v22, %v1660_v36  ;;  %2627 = vpow.bf16 %v1548_v20  ;;  %v1598_v16 = vunpack.c.h.bf16 %v3492_v11  ;;  %v1599_v32 = vunpack.c.l.bf16 %v3500_v62 }
 0x235   : > { %v1669_v30 = vadd.f32 %v1668_v41, %v1596_v21  ;;  %v3504_v63 = vpop.eup %2607  ;;  %v1643_v50 = vadd.f32 %v1642_v43, %v1641_v48  ;;  %2468 = vmatpush3.bf16.msra.mxu0 %v3305_v3  ;;  %2629 = vpow.bf16 %v1545_v1  ;;  %v1557_v3 = vmul.f32 %v3471_v2, %v1553_v57 }
 0x236   : > { %v1663_v34 = vrot.slane %v1662_v6, 2  ;;  %2469 = vmatprep.subr.bf16.mxu0 %v3675_v51  ;;  %v1600_v40 = vunpack.c.h.bf16 %v3500_v62  ;;  %v1601_v8 = vunpack.c.l.bf16 %v3504_v63  ;;  %v1602_v59 = vunpack.c.h.bf16 %v3504_v63 }
 0x237   : > { %v3506_v31 = vpop.eup %2609  ;;  %v1670_v26 = vadd.f32 %v1669_v30, %v1597_v7  ;;  %v1644_v60 = vrot.slane %v1643_v50, 1  ;;  %v1327_v20 = vsub.f32 %v3329_v61, %v3342_v39 }
 0x238   : > { %v3510_v33 = vpop.eup %2611  ;;  %v1609_v19 = vunpack.c.l.bf16 %v3506_v31  ;;  %v1610_v14 = vunpack.c.h.bf16 %v3506_v31  ;;  %v1664_v47 = vadd.f32 %v1663_v34, %v1662_v6 }
 0x239   : > { %v1671_v0 = vadd.f32 %v1670_v26, %v1598_v16  ;;  %v1611_v44 = vunpack.c.l.bf16 %v3510_v33  ;;  %v1645_v54 = vadd.f32 %v1644_v60, %v1643_v50  ;;  %2470 = vmatpush3.bf16.msra.mxu0 %v3299_v12  ;;  %v1612_v24 = vunpack.c.h.bf16 %v3510_v33 }
 0x23a   : > { %v1688_v9 = vadd.f32 %v1610_v14, %v1609_v19  ;;  %v3518_v25 = vpop.eup %2613  ;;  %v1665_v56 = vrot.slane %v1664_v47, 1  ;;  %2495 = vmatprep.subr.bf16.mxu0 %v3675_v51  ;;  %v1333_v34 = vmul.f32 1.442695, %v1327_v20 }
 0x23b   : > { %v1672_v46 = vadd.f32 %v1671_v0, %v1599_v32  ;;  %v2616_v42 = vpop.eup %2615  ;;  %v1709_v23 = vadd.f32 %v1645_v54, %v1557_v3  ;;  %v1613_v12 = vunpack.c.l.bf16 %v3518_v25  ;;  %v1614_v29 = vunpack.c.h.bf16 %v3518_v25 }
 0x23c   : > { %v1689_v27 = vadd.f32 %v1688_v9, %v1611_v44  ;;  %v3525_v38 = vpop.eup %2617  ;;  %v1666_v18 = vadd.f32 %v1665_v56, %v1664_v47  ;;  %2472 = vmatmul.mubr.bf16.vlgmr.msra.gmra.mxu0 %v572_v17  ;;  %v1603_v58 = vunpack.c.l.bf16 %v2616_v42  ;;  %v1604_v43 = vunpack.c.h.bf16 %v2616_v42  ;;  %v3690_v44 = vld [vmem:[#allocation6_spill] sm:$0xff]  ;;  %v3691_v9 = vld [vmem:[#allocation9_spill] sm:$0xff] }
 0x23d   : > { %v1673_v53 = vadd.f32 %v1672_v46, %v1600_v40  ;;  %1713 = vst [vmem:[#allocation4] sm:$0x1] %v1709_v23  ;;  %2511 = vmatprep.mubr.msk.bf16.mxu0 %vm2670_vm3, %v3675_v51  ;;  %v1615_v22 = vunpack.c.l.bf16 %v3525_v38  ;;  %v1616_v7 = vunpack.c.h.bf16 %v3525_v38  ;;  %2631 = vpow2.f32 %v1333_v34 }
 0x23e   : > { %v2620_v28 = vpop.eup %2619  ;;  %v1690_v45 = vadd.f32 %v1689_v27, %v1612_v24  ;;  %v1710_v55 = vadd.f32 %v1666_v18, %v1558_v4  ;;  %v1328_v3 = vsub.f32 %v3691_v9, %v3690_v44 }
 0x23f   : > { %v3530_v15 = vpop.eup %2621  ;;  %v1674_v5 = vadd.f32 %v1673_v53, %v1601_v8  ;;  %2476 = vmatpush3.bf16.msra.mxu1 %v2620_v28  ;;  %v1607_v47 = vunpack.c.l.bf16 %v2620_v28  ;;  %v1608_v54 = vunpack.c.h.bf16 %v2620_v28 }
 0x240   : > { %v1691_v10 = vadd.f32 %v1690_v45, %v1613_v12  ;;  %2496 = vmatpush3.bf16.msra.mxu0 %v3530_v15  ;;  %2477 = vmatprep.subr.bf16.mxu1 %v3675_v51  ;;  %v2624_v36 = vpop.eup %2623  ;;  %1714 = vst [vmem:[#allocation4 + $0x1] sm:$0x1] %v1710_v55  ;;  %v1335_v24 = vmul.f32 1.442695, %v1328_v3  ;;  %v1623_v4 = vunpack.c.l.bf16 %v3530_v15  ;;  %v1555_v45 = vld [vmem:[#allocation4 + $0x2] sm:$0x1] }
 0x241   : > { %v1675_v35 = vadd.f32 %v1674_v5, %v1602_v59  ;;  %2497 = vmatprep.subr.bf16.mxu0 %v3675_v51  ;;  %v2626_v48 = vpop.eup %2625  ;;  %v1605_v1 = vunpack.c.l.bf16 %v2624_v36  ;;  %v1606_v26 = vunpack.c.h.bf16 %v2624_v36 }
 0x242   : > { %v1692_v21 = vadd.f32 %v1691_v10, %v1614_v29  ;;  %v2628_v41 = vpop.eup %2627  ;;  %v1617_v61 = vunpack.c.l.bf16 %v2626_v48  ;;  %v1618_v19 = vunpack.c.h.bf16 %v2626_v48  ;;  %2633 = vpow2.f32 %v1335_v24  ;;  %v573_v29 = vld [vmem:[%s3469_s18 + $0x8] sm:$0xf] }
 0x243   : > { %v1676_v6 = vadd.f32 %v1675_v35, %v1603_v58  ;;  %2478 = vmatpush3.bf16.msra.mxu1 %v2624_v36  ;;  %v2630_v16 = vpop.eup %2629  ;;  %v1621_v56 = vunpack.c.l.bf16 %v2628_v41  ;;  %v1622_v23 = vunpack.c.h.bf16 %v2628_v41  ;;  %v574_v36 = vld [vmem:[%s3469_s18 + $0xc] sm:$0xf]  ;;  %v1556_v35 = vld [vmem:[#allocation4 + $0x3] sm:$0x1] }
 0x244   : > { %v1693_v30 = vadd.f32 %v1692_v21, %v1615_v22  ;;  %2498 = vmatpush3.bf16.msra.mxu0 %v2628_v41  ;;  %2479 = vmatprep.subr.bf16.mxu1 %v3675_v51  ;;  %v1619_v32 = vunpack.c.l.bf16 %v2630_v16  ;;  %v1620_v40 = vunpack.c.h.bf16 %v2630_v16 }
 0x245   : > { %v1677_v50 = vadd.f32 %v1676_v6, %v1604_v43  ;;  %2499 = vmatprep.subr.bf16.mxu0 %v3675_v51  ;;  %v3692_v6 = vld [vmem:[#allocation22_spill] sm:$0xff] }
 0x246   : > { %v1694_v39 = vadd.f32 %v1693_v30, %v1616_v7  ;;  %v1888_v7 = vrot.slane %v3471_v2, %v3692_v6  ;;  %v1892_v34 = vrot.slane %v3488_v49, %v3692_v6 }
 0x247   : > { %v1678_v57 = vadd.f32 %v1677_v50, %v1605_v1  ;;  %2480 = vmatpush3.bf16.msra.mxu1 %v2616_v42  ;;  %v1925_v21 = vld [vmem:[#allocation4 + $0x1] sm:$0x1] }
 0x248   : > { %v1695_v14 = vadd.f32 %v1694_v39, %v1617_v61  ;;  %2500 = vmatpush3.bf16.msra.mxu0 %v2630_v16  ;;  %2481 = vmatprep.subr.bf16.mxu1 %v3675_v51  ;;  %v1905_v50 = vmul.f32 0.0, %v1888_v7 }
 0x249   : > { %v1679_v60 = vadd.f32 %v1678_v57, %v1606_v26  ;;  %2501 = vmatprep.subr.bf16.mxu0 %v3675_v51  ;;  %v1906_v57 = vmul.f32 0.0, %v1892_v34 }
 0x24a   : > { %v1696_v0 = vadd.f32 %v1695_v14, %v1618_v19  ;;  %v3562_v12 = vpop.eup %2631 }
 0x24b   : > { %2482 = vmatpush3.bf16.msra.mxu1 %v3504_v63  ;;  %v1680_v37 = vadd.f32 %v1679_v60, %v1607_v47  ;;  %v1896_v49 = vrot.slane %v3562_v12, %v3692_v6 }
 0x24c   : > { %v1697_v46 = vadd.f32 %v1696_v0, %v1619_v32  ;;  %2502 = vmatpush3.bf16.msra.mxu0 %v2626_v48  ;;  %2483 = vmatprep.subr.bf16.mxu1 %v3675_v51 }
 0x24d   : > { %2503 = vmatprep.subr.bf16.mxu0 %v3675_v51  ;;  %v1681_v17 = vadd.f32 %v1680_v37, %v1608_v54 }
 0x24e   : > { %v1698_v42 = vadd.f32 %v1697_v46, %v1620_v40 }
 0x24f   : > { %2484 = vmatpush3.bf16.msra.mxu1 %v3500_v62  ;;  %v1682_v27 = vrot.slane %v1681_v17, 4  ;;  %v1624_v62 = vunpack.c.h.bf16 %v3530_v15  ;;  %v1559_v15 = vmul.f32 %v3562_v12, %v1555_v45  ;;  %v2634_v58 = vpop.eup %2633 }
 0x250   : > { %v1699_v8 = vadd.f32 %v1698_v42, %v1621_v56  ;;  %2504 = vmatpush3.bf16.msra.mxu0 %v3525_v38  ;;  %2485 = vmatprep.subr.bf16.mxu1 %v3675_v51  ;;  %v1900_v37 = vrot.slane %v2634_v58, %v3692_v6 }
 0x251   : > { %2505 = vmatprep.subr.bf16.mxu0 %v3675_v51  ;;  %v1683_v63 = vadd.f32 %v1682_v27, %v1681_v17  ;;  %v1907_v17 = vmul.f32 0.0, %v1896_v49 }
 0x252   : > { %v1700_v53 = vadd.f32 %v1699_v8, %v1622_v23  ;;  %v1908_v42 = vmul.f32 0.0, %v1900_v37 }
 0x253   : > { %2486 = vmatpush3.bf16.msra.mxu1 %v3492_v11  ;;  %v1684_v18 = vrot.slane %v1683_v63, 2 }
 0x254   : > { %2506 = vmatpush3.bf16.msra.mxu0 %v3518_v25  ;;  %2487 = vmatprep.subr.bf16.mxu1 %v3675_v51  ;;  %v1701_v28 = vadd.f32 %v1700_v53, %v1623_v4 }
 0x255   : > { %2507 = vmatprep.subr.bf16.mxu0 %v3675_v51  ;;  %v1685_v38 = vadd.f32 %v1684_v18, %v1683_v63 }
 0x256   : > { %v1702_v59 = vadd.f32 %v1701_v28, %v1624_v62 }
 0x257   : > { %2488 = vmatpush3.bf16.msra.mxu1 %v3482_v13  ;;  %v1686_v11 = vrot.slane %v1685_v38, 1 }
 0x258   : > { %2508 = vmatpush3.bf16.msra.mxu0 %v3510_v33  ;;  %2489 = vmatprep.subr.bf16.mxu1 %v3675_v51  ;;  %v1703_v25 = vrot.slane %v1702_v59, 4 }
 0x259   : > { %2509 = vmatprep.subr.bf16.mxu0 %v3675_v51  ;;  %v1687_v5 = vadd.f32 %v1686_v11, %v1685_v38  ;;  %v1560_v51 = vmul.f32 %v2634_v58, %v1556_v35  ;;  %v2562_v11 = vld [vmem:[%s3610_s5 + $0x8] sm:$0xff]  }
 0x25a   : > { %v1704_v55 = vadd.f32 %v1703_v25, %v1702_v59  ;;  %v1977_v25 = vpop.permute.xlu0 %1976 }
 0x25b   : > { %2490 = vmatpush3.bf16.msra.mxu1 %v3477_v52  ;;  %v1711_v10 = vadd.f32 %v1687_v5, %v1559_v15  ;;  %v2561_v52 = vld [vmem:[%s3610_s5] sm:$0xff]   ;;  %v1982_v15 = vpop.permute.xlu1 %1981 }
 0x25c   : > { %2510 = vmatpush3.bf16.msra.mxu0 %v3506_v31  ;;  %v1705_v13 = vrot.slane %v1704_v55, 2  ;;  %v1924_v31 = vld [vmem:[#allocation4] sm:$0x1] }
 0x25d   : > { %1715 = vst [vmem:[#allocation4 + $0x2] sm:$0x1] %v1711_v10  ;;  %2635 = vrcp.f32 %v1924_v31 }
 0x25e   : > { %2492 = vmatmul.mubr.bf16.vlgmr.msra.gmra.mxu1 %v573_v29  ;;  %v1706_v33 = vadd.f32 %v1705_v13, %v1704_v55  ;;  %2637 = vrcp.f32 %v1925_v21  ;;  %v1987_v5 = vpop.permute.xlu0 %1986 }
 0x25f   : > { %2512 = vmatmul.mubr.bf16.vlgmr.msra.gmra.mxu0 %v574_v36  ;;  %2519 = vmatprep.mubr.msk.bf16.mxu1 %vm487_vm0, %v2561_v52  ;;  %v1992_v13 = vpop.permute.xlu1 %1991 }
 0x260   : > { %v1707_v20 = vrot.slane %v1706_v33, 1 }
 0x262   : > { %v1708_v48 = vadd.f32 %v1707_v20, %v1706_v33 }
 0x264   : > { %v1712_v22 = vadd.f32 %v1708_v48, %v1560_v51  ;;  %v1926_v3 = vld [vmem:[#allocation4 + $0x2] sm:$0x1] }
 0x265   : > { %2639 = vrcp.f32 %v1926_v3 }
 0x266   : > { %1716 = vst [vmem:[#allocation4 + $0x3] sm:$0x1] %v1712_v22 }
 0x26a   : > { %v2636_v61 = vpop.eup %2635 }
 0x26b   : > { %v2638_v16 = vpop.eup %2637  ;;  %v1943_v26 = vrot.slane %v2636_v61, %v3692_v6 }
 0x26c   : > { %v1947_v47 = vrot.slane %v2638_v16, %v3692_v6 }
 0x26d   : > { %v1927_v54 = vld [vmem:[#allocation4 + $0x3] sm:$0x1] }
 0x26e   : > { %2641 = vrcp.f32 %v1927_v54 }
 0x272   : > { %v2640_v40 = vpop.eup %2639 }
 0x273   : > { %v1951_v27 = vrot.slane %v2640_v40, %v3692_v6 }
 0x27b   : > { %v2642_v46 = vpop.eup %2641 }
 0x27c   : > { %v1955_v63 = vrot.slane %v2642_v46, %v3692_v6 }
 0x2f1   : > { %v1751_v41 = vpop.f32.mrf.mxu1 }
 0x2f2   : > { %v1909_v39 = vadd.f32 %v1905_v50, %v1751_v41 }
 0x2f3   : > { %v2453_v43 = vpop.f32.mrf.mxu1 }
 0x2f4   : > { %v1960_v14 = vmul.f32 %v1943_v26, %v1909_v39 }
 0x2f5   : > { %v1754_v30 = vpop.f32.mrf.mxu1 }
 0x2f7   : > { %v2454_v1 = vpop.f32.mrf.mxu1 }
 0x2fc   : > { %v1791_v19 = vpop.f32.mrf.mxu0 }
 0x2fd   : > { %v1910_v60 = vadd.f32 %v1906_v57, %v1791_v19 }
 0x2fe   : > { %v2473_v32 = vpop.f32.mrf.mxu0 }
 0x2ff   : > { %v1961_v0 = vmul.f32 %v1947_v47, %v1910_v60 }
 0x300   : > { %v1794_v2 = vpop.f32.mrf.mxu0 }
 0x301   : > { %v1964_v44 = vpack.c.bf16 %v1961_v0, %v1960_v14 }
 0x302   : > { %v2474_v9 = vpop.f32.mrf.mxu0 }
 0x31e   : > { %v1831_v56 = vpop.f32.mrf.mxu1 }
 0x31f   : > { %v1911_v24 = vadd.f32 %v1907_v17, %v1831_v56  ;;  %v1871_v23 = vpop.f32.mrf.mxu0 }
 0x320   : > { %v1912_v8 = vadd.f32 %v1908_v42, %v1871_v23  ;;  %v2493_v53 = vpop.f32.mrf.mxu1 }
 0x321   : > { %v1962_v4 = vmul.f32 %v1951_v27, %v1911_v24  ;;  %v2513_v18 = vpop.f32.mrf.mxu0 }
 0x322   : > { %v1963_v62 = vmul.f32 %v1955_v63, %v1912_v8  ;;  %v1834_v28 = vpop.f32.mrf.mxu1 }
 0x323   : > { %v1874_v38 = vpop.f32.mrf.mxu0 }
 0x324   : > { %v2494_v12 = vpop.f32.mrf.mxu1  ;;  %v1965_v45 = vpack.c.bf16 %v1963_v62, %v1962_v4 }
 0x325   : > { %v2514_v59 = vpop.f32.mrf.mxu0 }
 0x326   : > { %2515 = vmatprep.subr.bf16.mxu1 %v1965_v45 }
 0x327   : > { %2516 = vmatpush3.bf16.msra.mxu1 %v1965_v45 }
 0x328   : > { %2517 = vmatprep.subr.bf16.mxu1 %v1964_v44 }
 0x32b   : > { %2518 = vmatpush3.bf16.msra.mxu1 %v1964_v44 }
 0x32e   : > { %2520 = vmatmul.mubr.msk.bf16.vlgmr.msra.gmra.mxu1 %vm487_vm0, %v2562_v11 }
 0x3ee   : > { %v2521_v55 = vpop.f32.mrf.mxu1 }
 0x3ef   : > { %v2054_v29 = vadd.f32 %v2521_v55, %v1987_v5 }
 0x3f0   : > { %v2045_v10 = vpop.f32.mrf.mxu1 }
 0x3f1   : > { %2062 = vst [vmem:[%s427_s26 + $0x10] sm:$0xff] %v2054_v29  ;;  %v2046_v36 = vadd.f32 %v2045_v10, %v1977_v25 }
 0x3f2   : > { %v2522_v33 = vpop.f32.mrf.mxu1 }
 0x3f3   : > { %2060 = vst [vmem:[%s427_s26] sm:$0xff] %v2046_v36  ;;  %v2057_v58 = vadd.f32 %v2522_v33, %v1992_v13 }
 0x3f4   : > { %v2048_v35 = vpop.f32.mrf.mxu1 }
 0x3f5   : > { %2063 = vst [vmem:[%s427_s26 + $0x18] sm:$0xff] %v2057_v58  ;;  %v2049_v20 = vadd.f32 %v2048_v35, %v1982_v15 }
 0x3f7   : > { %2061 = vst [vmem:[%s427_s26 + $0x8] sm:$0xff] %v2049_v20 }
 0x3f8 PF: > { %s18_s29 = sadd.s32 1, %s2665_s29   ;;  %s3693_s27 = smov %s2661_s28 }
 0x3f9   : > { %p15_p5 = scmp.ge.s32.totalorder %s18_s29, 4   ;;  %s3694_s28 = smov %s3696_s30 }
 0x3fb   :  { %17 = sbr.rel (!%p15_p5) target bundleno = 2 (0x2), region = 99 }

</bundles_post_ra>
